<compile_context>
chip_gen: v6e
topology: v6e:2x2x1
jax: 0.10.0
libtpu: 0.0.40
codegen_flags: <defaults>
</compile_context>

<pallas_src>
import functools
import math

import jax
import jax.numpy as jnp
from jax import lax
from jax.experimental import pallas as pl
from jax.experimental.pallas import tpu as pltpu

# MXU operand dtype (accumulation and all statistics stay f32).
_MATMUL_DTYPE = jnp.bfloat16
_NEG = -1e30  # large finite negative instead of -inf (avoids NaN rows)


def _chip_config():
    """Per-generation (vmem_limit_bytes, tile_m)."""
    try:
        kind = jax.devices()[0].device_kind.lower()
    except Exception:  # pragma: no cover - defensive
        kind = ""
    if any(g in kind for g in ("v4", "v5", "v6")):   # 128 MiB physical VMEM
        return 100 * 1024 * 1024, 512
    return 48 * 1024 * 1024, 256                      # v7x (64 MiB) / unknown


_VMEM_LIMIT, _DEFAULT_TILE_M = _chip_config()


def _cp(semantics):
    return pltpu.CompilerParams(dimension_semantics=semantics,
                                vmem_limit_bytes=_VMEM_LIMIT)


def _tile_m(m, tile=None):
    tile = _DEFAULT_TILE_M if tile is None else tile
    return m if m <= tile else tile


def _const_spec(shape):
    """Grid-invariant operand block: same block every step, single-buffered."""
    idx = lambda *_: (0,) * len(shape)
    try:
        return pl.BlockSpec(shape, idx, pipeline_mode=pl.Buffered(1))
    except TypeError:  # older jax without pipeline_mode kwarg
        return pl.BlockSpec(shape, idx)


# ----------------------------------------------------------------------------
# Kernels
# ----------------------------------------------------------------------------
def _self_attn_kernel(x_ref, causal_ref, kpad_ref, wqkv_ref, bqkv_ref, o_ref, *,
                      num_heads, head_dim, scale, embed_dim):
    """Fused QKV projection + multi-head self-attention for one batch element."""
    E, D = embed_dim, head_dim
    x = x_ref[0]                                                      # (T, E) bf16
    qkv = jnp.dot(x, wqkv_ref[...],
                  preferred_element_type=jnp.float32) + bqkv_ref[...]  # (T, 3E) f32
    # (T,T) causal/attn mask (grid-invariant) + (1,T) key-padding row, per batch.
    mask = causal_ref[...] + kpad_ref[0]                               # (T, T) f32
    for h in range(num_heads):
        q = (qkv[:, h * D:(h + 1) * D] * scale).astype(_MATMUL_DTYPE)          # (T, D)
        k = qkv[:, E + h * D:E + (h + 1) * D].astype(_MATMUL_DTYPE)            # (T, D)
        v = qkv[:, 2 * E + h * D:2 * E + (h + 1) * D].astype(_MATMUL_DTYPE)    # (T, D)
        # q @ k^T: contract head_dim of both operands (no explicit transpose).
        s = lax.dot_general(q, k, (((1,), (1,)), ((), ())),
                            preferred_element_type=jnp.float32) + mask          # (T, T)
        p = jnp.exp(s - jnp.max(s, axis=-1, keepdims=True))
        l = jnp.sum(p, axis=-1, keepdims=True)                                   # (T, 1)
        o = jnp.dot(p.astype(_MATMUL_DTYPE), v,
                    preferred_element_type=jnp.float32)                          # (T, D)
        o = o * pl.reciprocal(l, approx=True)      # normalize the (T,D) output
        o_ref[0, :, h * D:(h + 1) * D] = o.astype(o_ref.dtype)   # direct store


def _cross_attn_kernel(xq_ref, enc_ref, kpad_ref, wq_ref, bq_ref, wkv_ref,
                       bkv_ref, o_ref, *, num_heads, head_dim, scale, embed_dim):
    """Fused Q / KV projections + multi-head cross-attention, one batch element."""
    E, D = embed_dim, head_dim
    q_all = jnp.dot(xq_ref[0], wq_ref[...],
                    preferred_element_type=jnp.float32) + bq_ref[...]   # (T, E) f32
    kv = jnp.dot(enc_ref[0], wkv_ref[...],
                 preferred_element_type=jnp.float32) + bkv_ref[...]     # (S, 2E) f32
    mask = kpad_ref[0]                                                  # (1, S) f32
    for h in range(num_heads):
        q = (q_all[:, h * D:(h + 1) * D] * scale).astype(_MATMUL_DTYPE)     # (T, D)
        k = kv[:, h * D:(h + 1) * D].astype(_MATMUL_DTYPE)                  # (S, D)
        v = kv[:, E + h * D:E + (h + 1) * D].astype(_MATMUL_DTYPE)          # (S, D)
        s = lax.dot_general(q, k, (((1,), (1,)), ((), ())),
                            preferred_element_type=jnp.float32) + mask       # (T, S)
        p = jnp.exp(s - jnp.max(s, axis=-1, keepdims=True))
        l = jnp.sum(p, axis=-1, keepdims=True)
        o = jnp.dot(p.astype(_MATMUL_DTYPE), v,
                    preferred_element_type=jnp.float32)                      # (T, D)
        o = o * pl.reciprocal(l, approx=True)
        o_ref[0, :, h * D:(h + 1) * D] = o.astype(o_ref.dtype)


def _proj_res_ln_kernel(a_ref, res_ref, w_ref, b_ref, g_ref, beta_ref, o_ref, *, eps):
    # LayerNorm((a @ w + b) + res)  -- fused out-projection / residual / norm.
    proj = jnp.dot(a_ref[...].astype(_MATMUL_DTYPE), w_ref[...],
                   preferred_element_type=jnp.float32) + b_ref[...]
    x = proj + res_ref[...].astype(jnp.float32)
    mu = jnp.mean(x, axis=-1, keepdims=True)
    var = jnp.mean(jnp.square(x - mu), axis=-1, keepdims=True)
    o_ref[...] = ((x - mu) * lax.rsqrt(var + eps) * g_ref[...]
                  + beta_ref[...]).astype(o_ref.dtype)


def _ffn_res_ln_kernel(x_ref, w1_ref, b1_ref, w2_ref, b2_ref, g_ref, beta_ref,
                       o_ref, *, eps):
    # LayerNorm(relu(x @ w1 + b1) @ w2 + b2 + x) -- fused FFN / residual / norm.
    x = x_ref[...].astype(jnp.float32)
    h = jnp.dot(x_ref[...].astype(_MATMUL_DTYPE), w1_ref[...],
                preferred_element_type=jnp.float32) + b1_ref[...]
    h = jnp.maximum(h, 0.0).astype(_MATMUL_DTYPE)   # relu intermediate kept bf16
    y = jnp.dot(h, w2_ref[...], preferred_element_type=jnp.float32) + b2_ref[...]
    z = y + x
    mu = jnp.mean(z, axis=-1, keepdims=True)
    var = jnp.mean(jnp.square(z - mu), axis=-1, keepdims=True)
    o_ref[...] = ((z - mu) * lax.rsqrt(var + eps) * g_ref[...]
                  + beta_ref[...]).astype(o_ref.dtype)


# ----------------------------------------------------------------------------
# Wrappers
# ----------------------------------------------------------------------------
def self_attention(x, causal, kpad, w_qkv, b_qkv, num_heads):
    # x: (B,T,E) bf16; causal: (T,T) f32 additive; kpad: (B,1,T) f32 additive.
    B, T, E = x.shape
    D = E // num_heads
    kernel = functools.partial(_self_attn_kernel, num_heads=num_heads,
                               head_dim=D, scale=1.0 / math.sqrt(D), embed_dim=E)
    return pl.pallas_call(
        kernel,
        grid=(B,),
        in_specs=[pl.BlockSpec((1, T, E), lambda b: (b, 0, 0)),
                  _const_spec((T, T)),
                  pl.BlockSpec((1, 1, T), lambda b: (b, 0, 0)),
                  _const_spec((E, 3 * E)),
                  _const_spec((1, 3 * E))],
        out_specs=pl.BlockSpec((1, T, E), lambda b: (b, 0, 0)),
        out_shape=jax.ShapeDtypeStruct((B, T, E), _MATMUL_DTYPE),
        compiler_params=_cp(("parallel",)),
    )(x, causal, kpad, w_qkv, b_qkv.reshape(1, 3 * E))


def cross_attention(xq, enc, kpad, wq, bq, w_kv, b_kv, num_heads):
    # xq: (B,T,E) bf16; enc: (B,S,E) bf16; kpad: (B,1,S) f32 additive.
    B, T, E = xq.shape
    S = enc.shape[1]
    D = E // num_heads
    kernel = functools.partial(_cross_attn_kernel, num_heads=num_heads,
                               head_dim=D, scale=1.0 / math.sqrt(D), embed_dim=E)
    return pl.pallas_call(
        kernel,
        grid=(B,),
        in_specs=[pl.BlockSpec((1, T, E), lambda b: (b, 0, 0)),
                  pl.BlockSpec((1, S, E), lambda b: (b, 0, 0)),
                  pl.BlockSpec((1, 1, S), lambda b: (b, 0, 0)),
                  _const_spec((E, E)),
                  _const_spec((1, E)),
                  _const_spec((E, 2 * E)),
                  _const_spec((1, 2 * E))],
        out_specs=pl.BlockSpec((1, T, E), lambda b: (b, 0, 0)),
        out_shape=jax.ShapeDtypeStruct((B, T, E), _MATMUL_DTYPE),
        compiler_params=_cp(("parallel",)),
    )(xq, enc, kpad, wq, bq.reshape(1, E), w_kv, b_kv.reshape(1, 2 * E))


def proj_residual_ln(a2d, res2d, w, b, gamma, beta, *, eps=1e-5,
                     out_dtype=_MATMUL_DTYPE, tile_m=None):
    M, K = a2d.shape
    E = w.shape[1]
    tm = _tile_m(M, tile_m)
    kernel = functools.partial(_proj_res_ln_kernel, eps=eps)
    return pl.pallas_call(
        kernel,
        grid=(pl.cdiv(M, tm),),
        in_specs=[pl.BlockSpec((tm, K), lambda i: (i, 0)),
                  pl.BlockSpec((tm, E), lambda i: (i, 0)),
                  _const_spec((K, E)),
                  _const_spec((1, E)),
                  _const_spec((1, E)),
                  _const_spec((1, E))],
        out_specs=pl.BlockSpec((tm, E), lambda i: (i, 0)),
        out_shape=jax.ShapeDtypeStruct((M, E), out_dtype),
        compiler_params=_cp(("parallel",)),
    )(a2d, res2d, w, b.reshape(1, E), gamma.reshape(1, E), beta.reshape(1, E))


def ffn_residual_ln(x2d, w1, b1, w2, b2, gamma, beta, *, eps=1e-5,
                    out_dtype=jnp.float32, tile_m=None):
    M, E = x2d.shape
    H = w1.shape[1]
    tm = _tile_m(M, tile_m)
    kernel = functools.partial(_ffn_res_ln_kernel, eps=eps)
    return pl.pallas_call(
        kernel,
        grid=(pl.cdiv(M, tm),),
        in_specs=[pl.BlockSpec((tm, E), lambda i: (i, 0)),
                  _const_spec((E, H)),
                  _const_spec((1, H)),
                  _const_spec((H, E)),
                  _const_spec((1, E)),
                  _const_spec((1, E)),
                  _const_spec((1, E))],
        out_specs=pl.BlockSpec((tm, E), lambda i: (i, 0)),
        out_shape=jax.ShapeDtypeStruct((M, E), out_dtype),
        compiler_params=_cp(("parallel",)),
    )(x2d, w1, b1.reshape(1, H), w2, b2.reshape(1, E),
      gamma.reshape(1, E), beta.reshape(1, E))


# ----------------------------------------------------------------------------
# DecoderLayer forward
# ----------------------------------------------------------------------------
def decoder_layer(x, encoded, tgt_pad_mask, src_pad_mask, attn_mask, params, num_heads):
    B, T, E = x.shape
    S = encoded.shape[1]
    neg = jnp.float32(_NEG)

    # (T,T) causal/attn additive mask stays un-broadcast (grid-invariant block);
    # key-padding masks become per-batch (B,1,len) additive rows.
    causal = attn_mask.astype(jnp.float32)                                     # (T, T)
    tgt_add = jnp.where(tgt_pad_mask, neg, jnp.float32(0.0)).reshape(B, 1, T)  # (B,1,T)
    src_add = jnp.where(src_pad_mask, neg, jnp.float32(0.0)).reshape(B, 1, S)  # (B,1,S)

    # bf16 activations between kernels (f32 statistics stay inside the kernels).
    x_bf = x.astype(_MATMUL_DTYPE)
    enc_bf = encoded.astype(_MATMUL_DTYPE)
    x2d = x_bf.reshape(B * T, E)

    # ----- self-attention (QKV fused) + out-proj/residual/norm1 -----
    p1 = params["mha1"]
    att = self_attention(x_bf, causal, tgt_add, p1["w_qkv"], p1["b_qkv"],
                         num_heads)                                   # (B,T,E) bf16
    att_norm = proj_residual_ln(att.reshape(B * T, E), x2d,
                                p1["wo"], p1["bo"],
                                params["ln1_g"], params["ln1_b"])     # (B*T,E) bf16

    # ----- cross-attention (Q/KV fused) + out-proj/residual/norm2 -----
    p2 = params["mha2"]
    att2 = cross_attention(att_norm.reshape(B, T, E), enc_bf, src_add,
                           p2["wq"], p2["bq"], p2["w_kv"], p2["b_kv"],
                           num_heads)                                  # (B,T,E) bf16
    att2_norm = proj_residual_ln(att2.reshape(B * T, E), att_norm,
                                 p2["wo"], p2["bo"],
                                 params["ln2_g"], params["ln2_b"])     # (B*T,E) bf16

    # ----- feed-forward + residual + norm3 (fully fused, f32 module output) -----
    out = ffn_residual_ln(att2_norm, params["w1"], params["b1"],
                          params["w2"], params["b2"],
                          params["ln3_g"], params["ln3_b"],
                          out_dtype=jnp.float32)                       # (B*T,E) f32
    return out.reshape(B, T, E)


# ----------------------------------------------------------------------------
# Deterministic parameter init (QKV / KV weights pre-fused, weights in bf16)
# ----------------------------------------------------------------------------
def init_params(key, embed_dim, d_hidden, *, weight_dtype=_MATMUL_DTYPE):
    E, Dh = embed_dim, d_hidden
    ks = jax.random.split(key, 12)

    def w(k, shape):
        return (jax.random.normal(k, shape, jnp.float32) * 0.05).astype(weight_dtype)

    def b(k, shape):
        return jax.random.normal(k, shape, jnp.float32) * 0.01

    return {
        "mha1": {"w_qkv": w(ks[0], (E, 3 * E)), "b_qkv": b(ks[1], (3 * E,)),
                 "wo":    w(ks[2], (E, E)),     "bo":    b(ks[3], (E,))},
        "mha2": {"wq":    w(ks[4], (E, E)),     "bq":    b(ks[5], (E,)),
                 "w_kv":  w(ks[6], (E, 2 * E)), "b_kv":  b(ks[7], (2 * E,)),
                 "wo":    w(ks[8], (E, E)),     "bo":    b(ks[9], (E,))},
        "ln1_g": jnp.ones((E,), jnp.float32), "ln1_b": jnp.zeros((E,), jnp.float32),
        "ln2_g": jnp.ones((E,), jnp.float32), "ln2_b": jnp.zeros((E,), jnp.float32),
        "ln3_g": jnp.ones((E,), jnp.float32), "ln3_b": jnp.zeros((E,), jnp.float32),
        "w1": w(ks[10], (E, Dh)), "b1": jnp.zeros((Dh,), jnp.float32),
        "w2": w(ks[11], (Dh, E)), "b2": jnp.zeros((E,), jnp.float32),
    }


# ----------------------------------------------------------------------------
if __name__ == "__main__":
    B, T, S = 2, 8, 8
    embed_dim, num_heads, d_hidden = 32, 4, 64

    root = jax.random.PRNGKey(0)
    k_x, k_enc, k_p = jax.random.split(root, 3)

    x = jax.random.normal(k_x, (B, T, embed_dim), jnp.float32)
    encoded = jax.random.normal(k_enc, (B, S, embed_dim), jnp.float32)

    # Causal additive attn_mask (T, T): 0 where allowed, large-negative above diag.
    causal = jnp.tril(jnp.ones((T, T), jnp.bool_))
    attn_mask = jnp.where(causal, 0.0, -1e9).astype(jnp.float32)

    # Key padding masks (True = ignore); pad the last position of batch 1.
    tgt_pad_mask = jnp.zeros((B, T), jnp.bool_).at[1, T - 1].set(True)
    src_pad_mask = jnp.zeros((B, S), jnp.bool_).at[1, S - 1].set(True)

    params = init_params(k_p, embed_dim, d_hidden)

    fwd = jax.jit(functools.partial(decoder_layer, num_heads=num_heads))
    out = jax.block_until_ready(
        fwd(x, encoded, tgt_pad_mask, src_pad_mask, attn_mask, params))

    assert out.shape == (B, T, embed_dim)
    assert bool(jnp.all(jnp.isfinite(out)))
    print("KERNEL_OK")
</pallas_src>

<mosaic_0001>
module attributes {stable_mosaic.version = 11 : i64} {
  func.func @_self_attn_kernel(%arg0: i32, %arg1: memref<1x8x32xbf16, #tpu.memory_space<vmem>>, %arg2: memref<8x8xf32, #tpu.memory_space<vmem>>, %arg3: memref<1x1x8xf32, #tpu.memory_space<vmem>>, %arg4: memref<32x96xbf16, #tpu.memory_space<vmem>>, %arg5: memref<1x96xf32, #tpu.memory_space<vmem>>, %arg6: memref<1x8x32xbf16, #tpu.memory_space<vmem>>) attributes {dimension_semantics = [#tpu.dimension_semantics<parallel>], iteration_bounds = array<i64: 2>, scalar_prefetch = 0 : i64, scratch_operands = 0 : i64, tpu.core_type = #tpu.core_type<tc>, window_params = [{transform_indices = @transform_0, window_bounds = array<i64: 1, 8, 32>}, {pipeline_mode = #tpu.pipeline_mode<synchronous>, transform_indices = @transform_1, window_bounds = array<i64: 8, 8>}, {transform_indices = @transform_2, window_bounds = array<i64: 1, 1, 8>}, {pipeline_mode = #tpu.pipeline_mode<synchronous>, transform_indices = @transform_3, window_bounds = array<i64: 32, 96>}, {pipeline_mode = #tpu.pipeline_mode<synchronous>, transform_indices = @transform_4, window_bounds = array<i64: 1, 96>}, {transform_indices = @transform_5, window_bounds = array<i64: 1, 8, 32>}]} {
    %c0 = arith.constant 0 : index
    %c0_0 = arith.constant 0 : index
    %c0_1 = arith.constant 0 : index
    %0 = vector.load %arg1[%c0, %c0_0, %c0_1] : memref<1x8x32xbf16, #tpu.memory_space<vmem>>, vector<1x8x32xbf16>
    %1 = vector.shape_cast %0 : vector<1x8x32xbf16> to vector<8x32xbf16>
    %c0_2 = arith.constant 0 : index
    %c0_3 = arith.constant 0 : index
    %2 = vector.load %arg4[%c0_2, %c0_3] : memref<32x96xbf16, #tpu.memory_space<vmem>>, vector<32x96xbf16>
    %cst = arith.constant dense<0.000000e+00> : vector<8x96xf32>
    %3 = tpu.matmul %1, %2, %cst {dimension_numbers = #tpu.dot_dimension_numbers<[1], [0], [0], [1], [0, 0, 1, 1], [], []>} : vector<8x32xbf16>, vector<32x96xbf16>, vector<8x96xf32> -> vector<8x96xf32>
    %c0_4 = arith.constant 0 : index
    %c0_5 = arith.constant 0 : index
    %4 = vector.load %arg5[%c0_4, %c0_5] : memref<1x96xf32, #tpu.memory_space<vmem>>, vector<1x96xf32>
    %5 = vector.broadcast %4 : vector<1x96xf32> to vector<8x96xf32>
    %6 = arith.addf %3, %5 : vector<8x96xf32>
    %c0_6 = arith.constant 0 : index
    %c0_7 = arith.constant 0 : index
    %7 = vector.load %arg2[%c0_6, %c0_7] : memref<8x8xf32, #tpu.memory_space<vmem>>, vector<8x8xf32>
    %c0_8 = arith.constant 0 : index
    %c0_9 = arith.constant 0 : index
    %c0_10 = arith.constant 0 : index
    %8 = vector.load %arg3[%c0_8, %c0_9, %c0_10] : memref<1x1x8xf32, #tpu.memory_space<vmem>>, vector<1x1x8xf32>
    %9 = vector.shape_cast %8 : vector<1x1x8xf32> to vector<1x8xf32>
    %10 = vector.broadcast %9 : vector<1x8xf32> to vector<8x8xf32>
    %11 = arith.addf %7, %10 : vector<8x8xf32>
    %12 = vector.extract_strided_slice %6 {offsets = [0, 0], sizes = [8, 8], strides = [1, 1]} : vector<8x96xf32> to vector<8x8xf32>
    %cst_11 = arith.constant 0.353553385 : f32
    %13 = vector.broadcast %cst_11 : f32 to vector<8x8xf32>
    %14 = arith.mulf %12, %13 : vector<8x8xf32>
    %15 = arith.truncf %14 : vector<8x8xf32> to vector<8x8xbf16>
    %16 = vector.extract_strided_slice %6 {offsets = [0, 32], sizes = [8, 8], strides = [1, 1]} : vector<8x96xf32> to vector<8x8xf32>
    %17 = arith.truncf %16 : vector<8x8xf32> to vector<8x8xbf16>
    %18 = vector.extract_strided_slice %6 {offsets = [0, 64], sizes = [8, 8], strides = [1, 1]} : vector<8x96xf32> to vector<8x8xf32>
    %19 = arith.truncf %18 : vector<8x8xf32> to vector<8x8xbf16>
    %cst_12 = arith.constant dense<0.000000e+00> : vector<8x8xf32>
    %20 = tpu.matmul %15, %17, %cst_12 {dimension_numbers = #tpu.dot_dimension_numbers<[1], [1], [0], [0], [0, 0, 1, 0], [], []>} : vector<8x8xbf16>, vector<8x8xbf16>, vector<8x8xf32> -> vector<8x8xf32>
    %21 = arith.addf %20, %11 : vector<8x8xf32>
    %cst_13 = arith.constant dense<0xFF800000> : vector<8xf32>
    %22 = vector.multi_reduction <maximumf>, %21, %cst_13 [1] : vector<8x8xf32> to vector<8xf32>
    %23 = vector.shape_cast %22 : vector<8xf32> to vector<8x1xf32>
    %24 = vector.broadcast %23 : vector<8x1xf32> to vector<8x8xf32>
    %25 = arith.subf %21, %24 : vector<8x8xf32>
    %26 = math.exp %25 : vector<8x8xf32>
    %cst_14 = arith.constant dense<0.000000e+00> : vector<8xf32>
    %27 = vector.multi_reduction <add>, %26, %cst_14 [1] : vector<8x8xf32> to vector<8xf32>
    %28 = vector.shape_cast %27 : vector<8xf32> to vector<8x1xf32>
    %29 = arith.truncf %26 : vector<8x8xf32> to vector<8x8xbf16>
    %cst_15 = arith.constant dense<0.000000e+00> : vector<8x8xf32>
    %30 = tpu.matmul %29, %19, %cst_15 {dimension_numbers = #tpu.dot_dimension_numbers<[1], [0], [0], [1], [0, 0, 1, 1], [], []>} : vector<8x8xbf16>, vector<8x8xbf16>, vector<8x8xf32> -> vector<8x8xf32>
    %31 = tpu.reciprocal %28 {approx = true} : vector<8x1xf32> -> vector<8x1xf32>
    %32 = vector.broadcast %31 : vector<8x1xf32> to vector<8x8xf32>
    %33 = arith.mulf %30, %32 : vector<8x8xf32>
    %34 = arith.truncf %33 : vector<8x8xf32> to vector<8x8xbf16>
    %c0_16 = arith.constant 0 : index
    %c0_17 = arith.constant 0 : index
    %c0_18 = arith.constant 0 : index
    %35 = vector.load %arg6[%c0_16, %c0_17, %c0_18] : memref<1x8x32xbf16, #tpu.memory_space<vmem>>, vector<1x8x8xbf16>
    %36 = vector.shape_cast %35 : vector<1x8x8xbf16> to vector<8x8xbf16>
    %37 = vector.shape_cast %34 : vector<8x8xbf16> to vector<1x8x8xbf16>
    tpu.vector_store %arg6[%c0_16, %c0_17, %c0_18], %37 {strides = array<i32>} : memref<1x8x32xbf16, #tpu.memory_space<vmem>>, vector<1x8x8xbf16>,
    %38 = vector.extract_strided_slice %6 {offsets = [0, 8], sizes = [8, 8], strides = [1, 1]} : vector<8x96xf32> to vector<8x8xf32>
    %cst_19 = arith.constant 0.353553385 : f32
    %39 = vector.broadcast %cst_19 : f32 to vector<8x8xf32>
    %40 = arith.mulf %38, %39 : vector<8x8xf32>
    %41 = arith.truncf %40 : vector<8x8xf32> to vector<8x8xbf16>
    %42 = vector.extract_strided_slice %6 {offsets = [0, 40], sizes = [8, 8], strides = [1, 1]} : vector<8x96xf32> to vector<8x8xf32>
    %43 = arith.truncf %42 : vector<8x8xf32> to vector<8x8xbf16>
    %44 = vector.extract_strided_slice %6 {offsets = [0, 72], sizes = [8, 8], strides = [1, 1]} : vector<8x96xf32> to vector<8x8xf32>
    %45 = arith.truncf %44 : vector<8x8xf32> to vector<8x8xbf16>
    %cst_20 = arith.constant dense<0.000000e+00> : vector<8x8xf32>
    %46 = tpu.matmul %41, %43, %cst_20 {dimension_numbers = #tpu.dot_dimension_numbers<[1], [1], [0], [0], [0, 0, 1, 0], [], []>} : vector<8x8xbf16>, vector<8x8xbf16>, vector<8x8xf32> -> vector<8x8xf32>
    %47 = arith.addf %46, %11 : vector<8x8xf32>
    %cst_21 = arith.constant dense<0xFF800000> : vector<8xf32>
    %48 = vector.multi_reduction <maximumf>, %47, %cst_21 [1] : vector<8x8xf32> to vector<8xf32>
    %49 = vector.shape_cast %48 : vector<8xf32> to vector<8x1xf32>
    %50 = vector.broadcast %49 : vector<8x1xf32> to vector<8x8xf32>
    %51 = arith.subf %47, %50 : vector<8x8xf32>
    %52 = math.exp %51 : vector<8x8xf32>
    %cst_22 = arith.constant dense<0.000000e+00> : vector<8xf32>
    %53 = vector.multi_reduction <add>, %52, %cst_22 [1] : vector<8x8xf32> to vector<8xf32>
    %54 = vector.shape_cast %53 : vector<8xf32> to vector<8x1xf32>
    %55 = arith.truncf %52 : vector<8x8xf32> to vector<8x8xbf16>
    %cst_23 = arith.constant dense<0.000000e+00> : vector<8x8xf32>
    %56 = tpu.matmul %55, %45, %cst_23 {dimension_numbers = #tpu.dot_dimension_numbers<[1], [0], [0], [1], [0, 0, 1, 1], [], []>} : vector<8x8xbf16>, vector<8x8xbf16>, vector<8x8xf32> -> vector<8x8xf32>
    %57 = tpu.reciprocal %54 {approx = true} : vector<8x1xf32> -> vector<8x1xf32>
    %58 = vector.broadcast %57 : vector<8x1xf32> to vector<8x8xf32>
    %59 = arith.mulf %56, %58 : vector<8x8xf32>
    %60 = arith.truncf %59 : vector<8x8xf32> to vector<8x8xbf16>
    %c0_24 = arith.constant 0 : index
    %c0_25 = arith.constant 0 : index
    %c8 = arith.constant 8 : index
    %61 = vector.load %arg6[%c0_24, %c0_25, %c8] : memref<1x8x32xbf16, #tpu.memory_space<vmem>>, vector<1x8x8xbf16>
    %62 = vector.shape_cast %61 : vector<1x8x8xbf16> to vector<8x8xbf16>
    %63 = vector.shape_cast %60 : vector<8x8xbf16> to vector<1x8x8xbf16>
    tpu.vector_store %arg6[%c0_24, %c0_25, %c8], %63 {strides = array<i32>} : memref<1x8x32xbf16, #tpu.memory_space<vmem>>, vector<1x8x8xbf16>,
    %64 = vector.extract_strided_slice %6 {offsets = [0, 16], sizes = [8, 8], strides = [1, 1]} : vector<8x96xf32> to vector<8x8xf32>
    %cst_26 = arith.constant 0.353553385 : f32
    %65 = vector.broadcast %cst_26 : f32 to vector<8x8xf32>
    %66 = arith.mulf %64, %65 : vector<8x8xf32>
    %67 = arith.truncf %66 : vector<8x8xf32> to vector<8x8xbf16>
    %68 = vector.extract_strided_slice %6 {offsets = [0, 48], sizes = [8, 8], strides = [1, 1]} : vector<8x96xf32> to vector<8x8xf32>
    %69 = arith.truncf %68 : vector<8x8xf32> to vector<8x8xbf16>
    %70 = vector.extract_strided_slice %6 {offsets = [0, 80], sizes = [8, 8], strides = [1, 1]} : vector<8x96xf32> to vector<8x8xf32>
    %71 = arith.truncf %70 : vector<8x8xf32> to vector<8x8xbf16>
    %cst_27 = arith.constant dense<0.000000e+00> : vector<8x8xf32>
    %72 = tpu.matmul %67, %69, %cst_27 {dimension_numbers = #tpu.dot_dimension_numbers<[1], [1], [0], [0], [0, 0, 1, 0], [], []>} : vector<8x8xbf16>, vector<8x8xbf16>, vector<8x8xf32> -> vector<8x8xf32>
    %73 = arith.addf %72, %11 : vector<8x8xf32>
    %cst_28 = arith.constant dense<0xFF800000> : vector<8xf32>
    %74 = vector.multi_reduction <maximumf>, %73, %cst_28 [1] : vector<8x8xf32> to vector<8xf32>
    %75 = vector.shape_cast %74 : vector<8xf32> to vector<8x1xf32>
    %76 = vector.broadcast %75 : vector<8x1xf32> to vector<8x8xf32>
    %77 = arith.subf %73, %76 : vector<8x8xf32>
    %78 = math.exp %77 : vector<8x8xf32>
    %cst_29 = arith.constant dense<0.000000e+00> : vector<8xf32>
    %79 = vector.multi_reduction <add>, %78, %cst_29 [1] : vector<8x8xf32> to vector<8xf32>
    %80 = vector.shape_cast %79 : vector<8xf32> to vector<8x1xf32>
    %81 = arith.truncf %78 : vector<8x8xf32> to vector<8x8xbf16>
    %cst_30 = arith.constant dense<0.000000e+00> : vector<8x8xf32>
    %82 = tpu.matmul %81, %71, %cst_30 {dimension_numbers = #tpu.dot_dimension_numbers<[1], [0], [0], [1], [0, 0, 1, 1], [], []>} : vector<8x8xbf16>, vector<8x8xbf16>, vector<8x8xf32> -> vector<8x8xf32>
    %83 = tpu.reciprocal %80 {approx = true} : vector<8x1xf32> -> vector<8x1xf32>
    %84 = vector.broadcast %83 : vector<8x1xf32> to vector<8x8xf32>
    %85 = arith.mulf %82, %84 : vector<8x8xf32>
    %86 = arith.truncf %85 : vector<8x8xf32> to vector<8x8xbf16>
    %c0_31 = arith.constant 0 : index
    %c0_32 = arith.constant 0 : index
    %c16 = arith.constant 16 : index
    %87 = vector.load %arg6[%c0_31, %c0_32, %c16] : memref<1x8x32xbf16, #tpu.memory_space<vmem>>, vector<1x8x8xbf16>
    %88 = vector.shape_cast %87 : vector<1x8x8xbf16> to vector<8x8xbf16>
    %89 = vector.shape_cast %86 : vector<8x8xbf16> to vector<1x8x8xbf16>
    tpu.vector_store %arg6[%c0_31, %c0_32, %c16], %89 {strides = array<i32>} : memref<1x8x32xbf16, #tpu.memory_space<vmem>>, vector<1x8x8xbf16>,
    %90 = vector.extract_strided_slice %6 {offsets = [0, 24], sizes = [8, 8], strides = [1, 1]} : vector<8x96xf32> to vector<8x8xf32>
    %cst_33 = arith.constant 0.353553385 : f32
    %91 = vector.broadcast %cst_33 : f32 to vector<8x8xf32>
    %92 = arith.mulf %90, %91 : vector<8x8xf32>
    %93 = arith.truncf %92 : vector<8x8xf32> to vector<8x8xbf16>
    %94 = vector.extract_strided_slice %6 {offsets = [0, 56], sizes = [8, 8], strides = [1, 1]} : vector<8x96xf32> to vector<8x8xf32>
    %95 = arith.truncf %94 : vector<8x8xf32> to vector<8x8xbf16>
    %96 = vector.extract_strided_slice %6 {offsets = [0, 88], sizes = [8, 8], strides = [1, 1]} : vector<8x96xf32> to vector<8x8xf32>
    %97 = arith.truncf %96 : vector<8x8xf32> to vector<8x8xbf16>
    %cst_34 = arith.constant dense<0.000000e+00> : vector<8x8xf32>
    %98 = tpu.matmul %93, %95, %cst_34 {dimension_numbers = #tpu.dot_dimension_numbers<[1], [1], [0], [0], [0, 0, 1, 0], [], []>} : vector<8x8xbf16>, vector<8x8xbf16>, vector<8x8xf32> -> vector<8x8xf32>
    %99 = arith.addf %98, %11 : vector<8x8xf32>
    %cst_35 = arith.constant dense<0xFF800000> : vector<8xf32>
    %100 = vector.multi_reduction <maximumf>, %99, %cst_35 [1] : vector<8x8xf32> to vector<8xf32>
    %101 = vector.shape_cast %100 : vector<8xf32> to vector<8x1xf32>
    %102 = vector.broadcast %101 : vector<8x1xf32> to vector<8x8xf32>
    %103 = arith.subf %99, %102 : vector<8x8xf32>
    %104 = math.exp %103 : vector<8x8xf32>
    %cst_36 = arith.constant dense<0.000000e+00> : vector<8xf32>
    %105 = vector.multi_reduction <add>, %104, %cst_36 [1] : vector<8x8xf32> to vector<8xf32>
    %106 = vector.shape_cast %105 : vector<8xf32> to vector<8x1xf32>
    %107 = arith.truncf %104 : vector<8x8xf32> to vector<8x8xbf16>
    %cst_37 = arith.constant dense<0.000000e+00> : vector<8x8xf32>
    %108 = tpu.matmul %107, %97, %cst_37 {dimension_numbers = #tpu.dot_dimension_numbers<[1], [0], [0], [1], [0, 0, 1, 1], [], []>} : vector<8x8xbf16>, vector<8x8xbf16>, vector<8x8xf32> -> vector<8x8xf32>
    %109 = tpu.reciprocal %106 {approx = true} : vector<8x1xf32> -> vector<8x1xf32>
    %110 = vector.broadcast %109 : vector<8x1xf32> to vector<8x8xf32>
    %111 = arith.mulf %108, %110 : vector<8x8xf32>
    %112 = arith.truncf %111 : vector<8x8xf32> to vector<8x8xbf16>
    %c0_38 = arith.constant 0 : index
    %c0_39 = arith.constant 0 : index
    %c24 = arith.constant 24 : index
    %113 = vector.load %arg6[%c0_38, %c0_39, %c24] : memref<1x8x32xbf16, #tpu.memory_space<vmem>>, vector<1x8x8xbf16>
    %114 = vector.shape_cast %113 : vector<1x8x8xbf16> to vector<8x8xbf16>
    %115 = vector.shape_cast %112 : vector<8x8xbf16> to vector<1x8x8xbf16>
    tpu.vector_store %arg6[%c0_38, %c0_39, %c24], %115 {strides = array<i32>} : memref<1x8x32xbf16, #tpu.memory_space<vmem>>, vector<1x8x8xbf16>,
    return
  }
  func.func @transform_0(%arg0: i32) -> (i32, i32, i32) {
    %c0_i32 = arith.constant 0 : i32
    %c0_i32_0 = arith.constant 0 : i32
    %c0_i32_1 = arith.constant 0 : i32
    return %arg0, %c0_i32, %c0_i32_0 : i32, i32, i32
  }
  func.func @transform_1(%arg0: i32) -> (i32, i32) {
    %c0_i32 = arith.constant 0 : i32
    %c0_i32_0 = arith.constant 0 : i32
    %c0_i32_1 = arith.constant 0 : i32
    return %c0_i32, %c0_i32_0 : i32, i32
  }
  func.func @transform_2(%arg0: i32) -> (i32, i32, i32) {
    %c0_i32 = arith.constant 0 : i32
    %c0_i32_0 = arith.constant 0 : i32
    %c0_i32_1 = arith.constant 0 : i32
    return %arg0, %c0_i32, %c0_i32_0 : i32, i32, i32
  }
  func.func @transform_3(%arg0: i32) -> (i32, i32) {
    %c0_i32 = arith.constant 0 : i32
    %c0_i32_0 = arith.constant 0 : i32
    %c0_i32_1 = arith.constant 0 : i32
    return %c0_i32, %c0_i32_0 : i32, i32
  }
  func.func @transform_4(%arg0: i32) -> (i32, i32) {
    %c0_i32 = arith.constant 0 : i32
    %c0_i32_0 = arith.constant 0 : i32
    %c0_i32_1 = arith.constant 0 : i32
    return %c0_i32, %c0_i32_0 : i32, i32
  }
  func.func @transform_5(%arg0: i32) -> (i32, i32, i32) {
    %c0_i32 = arith.constant 0 : i32
    %c0_i32_0 = arith.constant 0 : i32
    %c0_i32_1 = arith.constant 0 : i32
    return %arg0, %c0_i32, %c0_i32_0 : i32, i32, i32
  }
}

module attributes {stable_mosaic.version = 11 : i64} {
  func.func @_proj_res_ln_kernel(%arg0: i32, %arg1: memref<16x32xbf16, #tpu.memory_space<vmem>>, %arg2: memref<16x32xbf16, #tpu.memory_space<vmem>>, %arg3: memref<32x32xbf16, #tpu.memory_space<vmem>>, %arg4: memref<1x32xf32, #tpu.memory_space<vmem>>, %arg5: memref<1x32xf32, #tpu.memory_space<vmem>>, %arg6: memref<1x32xf32, #tpu.memory_space<vmem>>, %arg7: memref<16x32xbf16, #tpu.memory_space<vmem>>) attributes {dimension_semantics = [#tpu.dimension_semantics<parallel>], iteration_bounds = array<i64: 1>, scalar_prefetch = 0 : i64, scratch_operands = 0 : i64, tpu.core_type = #tpu.core_type<tc>, window_params = [{transform_indices = @transform_0, window_bounds = array<i64: 16, 32>}, {transform_indices = @transform_1, window_bounds = array<i64: 16, 32>}, {pipeline_mode = #tpu.pipeline_mode<synchronous>, transform_indices = @transform_2, window_bounds = array<i64: 32, 32>}, {pipeline_mode = #tpu.pipeline_mode<synchronous>, transform_indices = @transform_3, window_bounds = array<i64: 1, 32>}, {pipeline_mode = #tpu.pipeline_mode<synchronous>, transform_indices = @transform_4, window_bounds = array<i64: 1, 32>}, {pipeline_mode = #tpu.pipeline_mode<synchronous>, transform_indices = @transform_5, window_bounds = array<i64: 1, 32>}, {transform_indices = @transform_6, window_bounds = array<i64: 16, 32>}]} {
    %c0 = arith.constant 0 : index
    %c0_0 = arith.constant 0 : index
    %0 = vector.load %arg1[%c0, %c0_0] : memref<16x32xbf16, #tpu.memory_space<vmem>>, vector<16x32xbf16>
    %c0_1 = arith.constant 0 : index
    %c0_2 = arith.constant 0 : index
    %1 = vector.load %arg3[%c0_1, %c0_2] : memref<32x32xbf16, #tpu.memory_space<vmem>>, vector<32x32xbf16>
    %cst = arith.constant dense<0.000000e+00> : vector<16x32xf32>
    %2 = tpu.matmul %0, %1, %cst {dimension_numbers = #tpu.dot_dimension_numbers<[1], [0], [0], [1], [0, 0, 1, 1], [], []>} : vector<16x32xbf16>, vector<32x32xbf16>, vector<16x32xf32> -> vector<16x32xf32>
    %c0_3 = arith.constant 0 : index
    %c0_4 = arith.constant 0 : index
    %3 = vector.load %arg4[%c0_3, %c0_4] : memref<1x32xf32, #tpu.memory_space<vmem>>, vector<1x32xf32>
    %4 = vector.broadcast %3 : vector<1x32xf32> to vector<16x32xf32>
    %5 = arith.addf %2, %4 : vector<16x32xf32>
    %c0_5 = arith.constant 0 : index
    %c0_6 = arith.constant 0 : index
    %6 = vector.load %arg2[%c0_5, %c0_6] : memref<16x32xbf16, #tpu.memory_space<vmem>>, vector<16x32xbf16>
    %7 = arith.extf %6 : vector<16x32xbf16> to vector<16x32xf32>
    %8 = arith.addf %5, %7 : vector<16x32xf32>
    %cst_7 = arith.constant dense<0.000000e+00> : vector<16xf32>
    %9 = vector.multi_reduction <add>, %8, %cst_7 [1] : vector<16x32xf32> to vector<16xf32>
    %10 = vector.shape_cast %9 : vector<16xf32> to vector<16x1xf32>
    %cst_8 = arith.constant 3.200000e+01 : f32
    %11 = vector.broadcast %cst_8 : f32 to vector<16x1xf32>
    %12 = arith.divf %10, %11 : vector<16x1xf32>
    %13 = vector.broadcast %12 : vector<16x1xf32> to vector<16x32xf32>
    %14 = arith.subf %8, %13 : vector<16x32xf32>
    %15 = arith.mulf %14, %14 : vector<16x32xf32>
    %cst_9 = arith.constant dense<0.000000e+00> : vector<16xf32>
    %16 = vector.multi_reduction <add>, %15, %cst_9 [1] : vector<16x32xf32> to vector<16xf32>
    %17 = vector.shape_cast %16 : vector<16xf32> to vector<16x1xf32>
    %cst_10 = arith.constant 3.200000e+01 : f32
    %18 = vector.broadcast %cst_10 : f32 to vector<16x1xf32>
    %19 = arith.divf %17, %18 : vector<16x1xf32>
    %20 = vector.broadcast %12 : vector<16x1xf32> to vector<16x32xf32>
    %21 = arith.subf %8, %20 : vector<16x32xf32>
    %cst_11 = arith.constant 9.99999974E-6 : f32
    %22 = vector.broadcast %cst_11 : f32 to vector<16x1xf32>
    %23 = arith.addf %19, %22 : vector<16x1xf32>
    %24 = math.rsqrt %23 : vector<16x1xf32>
    %25 = vector.broadcast %24 : vector<16x1xf32> to vector<16x32xf32>
    %26 = arith.mulf %21, %25 : vector<16x32xf32>
    %c0_12 = arith.constant 0 : index
    %c0_13 = arith.constant 0 : index
    %27 = vector.load %arg5[%c0_12, %c0_13] : memref<1x32xf32, #tpu.memory_space<vmem>>, vector<1x32xf32>
    %28 = vector.broadcast %27 : vector<1x32xf32> to vector<16x32xf32>
    %29 = arith.mulf %26, %28 : vector<16x32xf32>
    %c0_14 = arith.constant 0 : index
    %c0_15 = arith.constant 0 : index
    %30 = vector.load %arg6[%c0_14, %c0_15] : memref<1x32xf32, #tpu.memory_space<vmem>>, vector<1x32xf32>
    %31 = vector.broadcast %30 : vector<1x32xf32> to vector<16x32xf32>
    %32 = arith.addf %29, %31 : vector<16x32xf32>
    %33 = arith.truncf %32 : vector<16x32xf32> to vector<16x32xbf16>
    %c0_16 = arith.constant 0 : index
    %c0_17 = arith.constant 0 : index
    %34 = vector.load %arg7[%c0_16, %c0_17] : memref<16x32xbf16, #tpu.memory_space<vmem>>, vector<16x32xbf16>
    tpu.vector_store %arg7[%c0_16, %c0_17], %33 {strides = array<i32>} : memref<16x32xbf16, #tpu.memory_space<vmem>>, vector<16x32xbf16>,
    return
  }
  func.func @transform_0(%arg0: i32) -> (i32, i32) {
    %c0_i32 = arith.constant 0 : i32
    %c0_i32_0 = arith.constant 0 : i32
    return %arg0, %c0_i32 : i32, i32
  }
  func.func @transform_1(%arg0: i32) -> (i32, i32) {
    %c0_i32 = arith.constant 0 : i32
    %c0_i32_0 = arith.constant 0 : i32
    return %arg0, %c0_i32 : i32, i32
  }
  func.func @transform_2(%arg0: i32) -> (i32, i32) {
    %c0_i32 = arith.constant 0 : i32
    %c0_i32_0 = arith.constant 0 : i32
    %c0_i32_1 = arith.constant 0 : i32
    return %c0_i32, %c0_i32_0 : i32, i32
  }
  func.func @transform_3(%arg0: i32) -> (i32, i32) {
    %c0_i32 = arith.constant 0 : i32
    %c0_i32_0 = arith.constant 0 : i32
    %c0_i32_1 = arith.constant 0 : i32
    return %c0_i32, %c0_i32_0 : i32, i32
  }
  func.func @transform_4(%arg0: i32) -> (i32, i32) {
    %c0_i32 = arith.constant 0 : i32
    %c0_i32_0 = arith.constant 0 : i32
    %c0_i32_1 = arith.constant 0 : i32
    return %c0_i32, %c0_i32_0 : i32, i32
  }
  func.func @transform_5(%arg0: i32) -> (i32, i32) {
    %c0_i32 = arith.constant 0 : i32
    %c0_i32_0 = arith.constant 0 : i32
    %c0_i32_1 = arith.constant 0 : i32
    return %c0_i32, %c0_i32_0 : i32, i32
  }
  func.func @transform_6(%arg0: i32) -> (i32, i32) {
    %c0_i32 = arith.constant 0 : i32
    %c0_i32_0 = arith.constant 0 : i32
    return %arg0, %c0_i32 : i32, i32
  }
}

module attributes {stable_mosaic.version = 11 : i64} {
  func.func @_cross_attn_kernel(%arg0: i32, %arg1: memref<1x8x32xbf16, #tpu.memory_space<vmem>>, %arg2: memref<1x8x32xbf16, #tpu.memory_space<vmem>>, %arg3: memref<1x1x8xf32, #tpu.memory_space<vmem>>, %arg4: memref<32x32xbf16, #tpu.memory_space<vmem>>, %arg5: memref<1x32xf32, #tpu.memory_space<vmem>>, %arg6: memref<32x64xbf16, #tpu.memory_space<vmem>>, %arg7: memref<1x64xf32, #tpu.memory_space<vmem>>, %arg8: memref<1x8x32xbf16, #tpu.memory_space<vmem>>) attributes {dimension_semantics = [#tpu.dimension_semantics<parallel>], iteration_bounds = array<i64: 2>, scalar_prefetch = 0 : i64, scratch_operands = 0 : i64, tpu.core_type = #tpu.core_type<tc>, window_params = [{transform_indices = @transform_0, window_bounds = array<i64: 1, 8, 32>}, {transform_indices = @transform_1, window_bounds = array<i64: 1, 8, 32>}, {transform_indices = @transform_2, window_bounds = array<i64: 1, 1, 8>}, {pipeline_mode = #tpu.pipeline_mode<synchronous>, transform_indices = @transform_3, window_bounds = array<i64: 32, 32>}, {pipeline_mode = #tpu.pipeline_mode<synchronous>, transform_indices = @transform_4, window_bounds = array<i64: 1, 32>}, {pipeline_mode = #tpu.pipeline_mode<synchronous>, transform_indices = @transform_5, window_bounds = array<i64: 32, 64>}, {pipeline_mode = #tpu.pipeline_mode<synchronous>, transform_indices = @transform_6, window_bounds = array<i64: 1, 64>}, {transform_indices = @transform_7, window_bounds = array<i64: 1, 8, 32>}]} {
    %c0 = arith.constant 0 : index
    %c0_0 = arith.constant 0 : index
    %c0_1 = arith.constant 0 : index
    %0 = vector.load %arg1[%c0, %c0_0, %c0_1] : memref<1x8x32xbf16, #tpu.memory_space<vmem>>, vector<1x8x32xbf16>
    %1 = vector.shape_cast %0 : vector<1x8x32xbf16> to vector<8x32xbf16>
    %c0_2 = arith.constant 0 : index
    %c0_3 = arith.constant 0 : index
    %2 = vector.load %arg4[%c0_2, %c0_3] : memref<32x32xbf16, #tpu.memory_space<vmem>>, vector<32x32xbf16>
    %cst = arith.constant dense<0.000000e+00> : vector<8x32xf32>
    %3 = tpu.matmul %1, %2, %cst {dimension_numbers = #tpu.dot_dimension_numbers<[1], [0], [0], [1], [0, 0, 1, 1], [], []>} : vector<8x32xbf16>, vector<32x32xbf16>, vector<8x32xf32> -> vector<8x32xf32>
    %c0_4 = arith.constant 0 : index
    %c0_5 = arith.constant 0 : index
    %4 = vector.load %arg5[%c0_4, %c0_5] : memref<1x32xf32, #tpu.memory_space<vmem>>, vector<1x32xf32>
    %5 = vector.broadcast %4 : vector<1x32xf32> to vector<8x32xf32>
    %6 = arith.addf %3, %5 : vector<8x32xf32>
    %c0_6 = arith.constant 0 : index
    %c0_7 = arith.constant 0 : index
    %c0_8 = arith.constant 0 : index
    %7 = vector.load %arg2[%c0_6, %c0_7, %c0_8] : memref<1x8x32xbf16, #tpu.memory_space<vmem>>, vector<1x8x32xbf16>
    %8 = vector.shape_cast %7 : vector<1x8x32xbf16> to vector<8x32xbf16>
    %c0_9 = arith.constant 0 : index
    %c0_10 = arith.constant 0 : index
    %9 = vector.load %arg6[%c0_9, %c0_10] : memref<32x64xbf16, #tpu.memory_space<vmem>>, vector<32x64xbf16>
    %cst_11 = arith.constant dense<0.000000e+00> : vector<8x64xf32>
    %10 = tpu.matmul %8, %9, %cst_11 {dimension_numbers = #tpu.dot_dimension_numbers<[1], [0], [0], [1], [0, 0, 1, 1], [], []>} : vector<8x32xbf16>, vector<32x64xbf16>, vector<8x64xf32> -> vector<8x64xf32>
    %c0_12 = arith.constant 0 : index
    %c0_13 = arith.constant 0 : index
    %11 = vector.load %arg7[%c0_12, %c0_13] : memref<1x64xf32, #tpu.memory_space<vmem>>, vector<1x64xf32>
    %12 = vector.broadcast %11 : vector<1x64xf32> to vector<8x64xf32>
    %13 = arith.addf %10, %12 : vector<8x64xf32>
    %c0_14 = arith.constant 0 : index
    %c0_15 = arith.constant 0 : index
    %c0_16 = arith.constant 0 : index
    %14 = vector.load %arg3[%c0_14, %c0_15, %c0_16] : memref<1x1x8xf32, #tpu.memory_space<vmem>>, vector<1x1x8xf32>
    %15 = vector.shape_cast %14 : vector<1x1x8xf32> to vector<1x8xf32>
    %16 = vector.extract_strided_slice %6 {offsets = [0, 0], sizes = [8, 8], strides = [1, 1]} : vector<8x32xf32> to vector<8x8xf32>
    %cst_17 = arith.constant 0.353553385 : f32
    %17 = vector.broadcast %cst_17 : f32 to vector<8x8xf32>
    %18 = arith.mulf %16, %17 : vector<8x8xf32>
    %19 = arith.truncf %18 : vector<8x8xf32> to vector<8x8xbf16>
    %20 = vector.extract_strided_slice %13 {offsets = [0, 0], sizes = [8, 8], strides = [1, 1]} : vector<8x64xf32> to vector<8x8xf32>
    %21 = arith.truncf %20 : vector<8x8xf32> to vector<8x8xbf16>
    %22 = vector.extract_strided_slice %13 {offsets = [0, 32], sizes = [8, 8], strides = [1, 1]} : vector<8x64xf32> to vector<8x8xf32>
    %23 = arith.truncf %22 : vector<8x8xf32> to vector<8x8xbf16>
    %cst_18 = arith.constant dense<0.000000e+00> : vector<8x8xf32>
    %24 = tpu.matmul %19, %21, %cst_18 {dimension_numbers = #tpu.dot_dimension_numbers<[1], [1], [0], [0], [0, 0, 1, 0], [], []>} : vector<8x8xbf16>, vector<8x8xbf16>, vector<8x8xf32> -> vector<8x8xf32>
    %25 = vector.broadcast %15 : vector<1x8xf32> to vector<8x8xf32>
    %26 = arith.addf %24, %25 : vector<8x8xf32>
    %cst_19 = arith.constant dense<0xFF800000> : vector<8xf32>
    %27 = vector.multi_reduction <maximumf>, %26, %cst_19 [1] : vector<8x8xf32> to vector<8xf32>
    %28 = vector.shape_cast %27 : vector<8xf32> to vector<8x1xf32>
    %29 = vector.broadcast %28 : vector<8x1xf32> to vector<8x8xf32>
    %30 = arith.subf %26, %29 : vector<8x8xf32>
    %31 = math.exp %30 : vector<8x8xf32>
    %cst_20 = arith.constant dense<0.000000e+00> : vector<8xf32>
    %32 = vector.multi_reduction <add>, %31, %cst_20 [1] : vector<8x8xf32> to vector<8xf32>
    %33 = vector.shape_cast %32 : vector<8xf32> to vector<8x1xf32>
    %34 = arith.truncf %31 : vector<8x8xf32> to vector<8x8xbf16>
    %cst_21 = arith.constant dense<0.000000e+00> : vector<8x8xf32>
    %35 = tpu.matmul %34, %23, %cst_21 {dimension_numbers = #tpu.dot_dimension_numbers<[1], [0], [0], [1], [0, 0, 1, 1], [], []>} : vector<8x8xbf16>, vector<8x8xbf16>, vector<8x8xf32> -> vector<8x8xf32>
    %36 = tpu.reciprocal %33 {approx = true} : vector<8x1xf32> -> vector<8x1xf32>
    %37 = vector.broadcast %36 : vector<8x1xf32> to vector<8x8xf32>
    %38 = arith.mulf %35, %37 : vector<8x8xf32>
    %39 = arith.truncf %38 : vector<8x8xf32> to vector<8x8xbf16>
    %c0_22 = arith.constant 0 : index
    %c0_23 = arith.constant 0 : index
    %c0_24 = arith.constant 0 : index
    %40 = vector.load %arg8[%c0_22, %c0_23, %c0_24] : memref<1x8x32xbf16, #tpu.memory_space<vmem>>, vector<1x8x8xbf16>
    %41 = vector.shape_cast %40 : vector<1x8x8xbf16> to vector<8x8xbf16>
    %42 = vector.shape_cast %39 : vector<8x8xbf16> to vector<1x8x8xbf16>
    tpu.vector_store %arg8[%c0_22, %c0_23, %c0_24], %42 {strides = array<i32>} : memref<1x8x32xbf16, #tpu.memory_space<vmem>>, vector<1x8x8xbf16>,
    %43 = vector.extract_strided_slice %6 {offsets = [0, 8], sizes = [8, 8], strides = [1, 1]} : vector<8x32xf32> to vector<8x8xf32>
    %cst_25 = arith.constant 0.353553385 : f32
    %44 = vector.broadcast %cst_25 : f32 to vector<8x8xf32>
    %45 = arith.mulf %43, %44 : vector<8x8xf32>
    %46 = arith.truncf %45 : vector<8x8xf32> to vector<8x8xbf16>
    %47 = vector.extract_strided_slice %13 {offsets = [0, 8], sizes = [8, 8], strides = [1, 1]} : vector<8x64xf32> to vector<8x8xf32>
    %48 = arith.truncf %47 : vector<8x8xf32> to vector<8x8xbf16>
    %49 = vector.extract_strided_slice %13 {offsets = [0, 40], sizes = [8, 8], strides = [1, 1]} : vector<8x64xf32> to vector<8x8xf32>
    %50 = arith.truncf %49 : vector<8x8xf32> to vector<8x8xbf16>
    %cst_26 = arith.constant dense<0.000000e+00> : vector<8x8xf32>
    %51 = tpu.matmul %46, %48, %cst_26 {dimension_numbers = #tpu.dot_dimension_numbers<[1], [1], [0], [0], [0, 0, 1, 0], [], []>} : vector<8x8xbf16>, vector<8x8xbf16>, vector<8x8xf32> -> vector<8x8xf32>
    %52 = vector.broadcast %15 : vector<1x8xf32> to vector<8x8xf32>
    %53 = arith.addf %51, %52 : vector<8x8xf32>
    %cst_27 = arith.constant dense<0xFF800000> : vector<8xf32>
    %54 = vector.multi_reduction <maximumf>, %53, %cst_27 [1] : vector<8x8xf32> to vector<8xf32>
    %55 = vector.shape_cast %54 : vector<8xf32> to vector<8x1xf32>
    %56 = vector.broadcast %55 : vector<8x1xf32> to vector<8x8xf32>
    %57 = arith.subf %53, %56 : vector<8x8xf32>
    %58 = math.exp %57 : vector<8x8xf32>
    %cst_28 = arith.constant dense<0.000000e+00> : vector<8xf32>
    %59 = vector.multi_reduction <add>, %58, %cst_28 [1] : vector<8x8xf32> to vector<8xf32>
    %60 = vector.shape_cast %59 : vector<8xf32> to vector<8x1xf32>
    %61 = arith.truncf %58 : vector<8x8xf32> to vector<8x8xbf16>
    %cst_29 = arith.constant dense<0.000000e+00> : vector<8x8xf32>
    %62 = tpu.matmul %61, %50, %cst_29 {dimension_numbers = #tpu.dot_dimension_numbers<[1], [0], [0], [1], [0, 0, 1, 1], [], []>} : vector<8x8xbf16>, vector<8x8xbf16>, vector<8x8xf32> -> vector<8x8xf32>
    %63 = tpu.reciprocal %60 {approx = true} : vector<8x1xf32> -> vector<8x1xf32>
    %64 = vector.broadcast %63 : vector<8x1xf32> to vector<8x8xf32>
    %65 = arith.mulf %62, %64 : vector<8x8xf32>
    %66 = arith.truncf %65 : vector<8x8xf32> to vector<8x8xbf16>
    %c0_30 = arith.constant 0 : index
    %c0_31 = arith.constant 0 : index
    %c8 = arith.constant 8 : index
    %67 = vector.load %arg8[%c0_30, %c0_31, %c8] : memref<1x8x32xbf16, #tpu.memory_space<vmem>>, vector<1x8x8xbf16>
    %68 = vector.shape_cast %67 : vector<1x8x8xbf16> to vector<8x8xbf16>
    %69 = vector.shape_cast %66 : vector<8x8xbf16> to vector<1x8x8xbf16>
    tpu.vector_store %arg8[%c0_30, %c0_31, %c8], %69 {strides = array<i32>} : memref<1x8x32xbf16, #tpu.memory_space<vmem>>, vector<1x8x8xbf16>,
    %70 = vector.extract_strided_slice %6 {offsets = [0, 16], sizes = [8, 8], strides = [1, 1]} : vector<8x32xf32> to vector<8x8xf32>
    %cst_32 = arith.constant 0.353553385 : f32
    %71 = vector.broadcast %cst_32 : f32 to vector<8x8xf32>
    %72 = arith.mulf %70, %71 : vector<8x8xf32>
    %73 = arith.truncf %72 : vector<8x8xf32> to vector<8x8xbf16>
    %74 = vector.extract_strided_slice %13 {offsets = [0, 16], sizes = [8, 8], strides = [1, 1]} : vector<8x64xf32> to vector<8x8xf32>
    %75 = arith.truncf %74 : vector<8x8xf32> to vector<8x8xbf16>
    %76 = vector.extract_strided_slice %13 {offsets = [0, 48], sizes = [8, 8], strides = [1, 1]} : vector<8x64xf32> to vector<8x8xf32>
    %77 = arith.truncf %76 : vector<8x8xf32> to vector<8x8xbf16>
    %cst_33 = arith.constant dense<0.000000e+00> : vector<8x8xf32>
    %78 = tpu.matmul %73, %75, %cst_33 {dimension_numbers = #tpu.dot_dimension_numbers<[1], [1], [0], [0], [0, 0, 1, 0], [], []>} : vector<8x8xbf16>, vector<8x8xbf16>, vector<8x8xf32> -> vector<8x8xf32>
    %79 = vector.broadcast %15 : vector<1x8xf32> to vector<8x8xf32>
    %80 = arith.addf %78, %79 : vector<8x8xf32>
    %cst_34 = arith.constant dense<0xFF800000> : vector<8xf32>
    %81 = vector.multi_reduction <maximumf>, %80, %cst_34 [1] : vector<8x8xf32> to vector<8xf32>
    %82 = vector.shape_cast %81 : vector<8xf32> to vector<8x1xf32>
    %83 = vector.broadcast %82 : vector<8x1xf32> to vector<8x8xf32>
    %84 = arith.subf %80, %83 : vector<8x8xf32>
    %85 = math.exp %84 : vector<8x8xf32>
    %cst_35 = arith.constant dense<0.000000e+00> : vector<8xf32>
    %86 = vector.multi_reduction <add>, %85, %cst_35 [1] : vector<8x8xf32> to vector<8xf32>
    %87 = vector.shape_cast %86 : vector<8xf32> to vector<8x1xf32>
    %88 = arith.truncf %85 : vector<8x8xf32> to vector<8x8xbf16>
    %cst_36 = arith.constant dense<0.000000e+00> : vector<8x8xf32>
    %89 = tpu.matmul %88, %77, %cst_36 {dimension_numbers = #tpu.dot_dimension_numbers<[1], [0], [0], [1], [0, 0, 1, 1], [], []>} : vector<8x8xbf16>, vector<8x8xbf16>, vector<8x8xf32> -> vector<8x8xf32>
    %90 = tpu.reciprocal %87 {approx = true} : vector<8x1xf32> -> vector<8x1xf32>
    %91 = vector.broadcast %90 : vector<8x1xf32> to vector<8x8xf32>
    %92 = arith.mulf %89, %91 : vector<8x8xf32>
    %93 = arith.truncf %92 : vector<8x8xf32> to vector<8x8xbf16>
    %c0_37 = arith.constant 0 : index
    %c0_38 = arith.constant 0 : index
    %c16 = arith.constant 16 : index
    %94 = vector.load %arg8[%c0_37, %c0_38, %c16] : memref<1x8x32xbf16, #tpu.memory_space<vmem>>, vector<1x8x8xbf16>
    %95 = vector.shape_cast %94 : vector<1x8x8xbf16> to vector<8x8xbf16>
    %96 = vector.shape_cast %93 : vector<8x8xbf16> to vector<1x8x8xbf16>
    tpu.vector_store %arg8[%c0_37, %c0_38, %c16], %96 {strides = array<i32>} : memref<1x8x32xbf16, #tpu.memory_space<vmem>>, vector<1x8x8xbf16>,
    %97 = vector.extract_strided_slice %6 {offsets = [0, 24], sizes = [8, 8], strides = [1, 1]} : vector<8x32xf32> to vector<8x8xf32>
    %cst_39 = arith.constant 0.353553385 : f32
    %98 = vector.broadcast %cst_39 : f32 to vector<8x8xf32>
    %99 = arith.mulf %97, %98 : vector<8x8xf32>
    %100 = arith.truncf %99 : vector<8x8xf32> to vector<8x8xbf16>
    %101 = vector.extract_strided_slice %13 {offsets = [0, 24], sizes = [8, 8], strides = [1, 1]} : vector<8x64xf32> to vector<8x8xf32>
    %102 = arith.truncf %101 : vector<8x8xf32> to vector<8x8xbf16>
    %103 = vector.extract_strided_slice %13 {offsets = [0, 56], sizes = [8, 8], strides = [1, 1]} : vector<8x64xf32> to vector<8x8xf32>
    %104 = arith.truncf %103 : vector<8x8xf32> to vector<8x8xbf16>
    %cst_40 = arith.constant dense<0.000000e+00> : vector<8x8xf32>
    %105 = tpu.matmul %100, %102, %cst_40 {dimension_numbers = #tpu.dot_dimension_numbers<[1], [1], [0], [0], [0, 0, 1, 0], [], []>} : vector<8x8xbf16>, vector<8x8xbf16>, vector<8x8xf32> -> vector<8x8xf32>
    %106 = vector.broadcast %15 : vector<1x8xf32> to vector<8x8xf32>
    %107 = arith.addf %105, %106 : vector<8x8xf32>
    %cst_41 = arith.constant dense<0xFF800000> : vector<8xf32>
    %108 = vector.multi_reduction <maximumf>, %107, %cst_41 [1] : vector<8x8xf32> to vector<8xf32>
    %109 = vector.shape_cast %108 : vector<8xf32> to vector<8x1xf32>
    %110 = vector.broadcast %109 : vector<8x1xf32> to vector<8x8xf32>
    %111 = arith.subf %107, %110 : vector<8x8xf32>
    %112 = math.exp %111 : vector<8x8xf32>
    %cst_42 = arith.constant dense<0.000000e+00> : vector<8xf32>
    %113 = vector.multi_reduction <add>, %112, %cst_42 [1] : vector<8x8xf32> to vector<8xf32>
    %114 = vector.shape_cast %113 : vector<8xf32> to vector<8x1xf32>
    %115 = arith.truncf %112 : vector<8x8xf32> to vector<8x8xbf16>
    %cst_43 = arith.constant dense<0.000000e+00> : vector<8x8xf32>
    %116 = tpu.matmul %115, %104, %cst_43 {dimension_numbers = #tpu.dot_dimension_numbers<[1], [0], [0], [1], [0, 0, 1, 1], [], []>} : vector<8x8xbf16>, vector<8x8xbf16>, vector<8x8xf32> -> vector<8x8xf32>
    %117 = tpu.reciprocal %114 {approx = true} : vector<8x1xf32> -> vector<8x1xf32>
    %118 = vector.broadcast %117 : vector<8x1xf32> to vector<8x8xf32>
    %119 = arith.mulf %116, %118 : vector<8x8xf32>
    %120 = arith.truncf %119 : vector<8x8xf32> to vector<8x8xbf16>
    %c0_44 = arith.constant 0 : index
    %c0_45 = arith.constant 0 : index
    %c24 = arith.constant 24 : index
    %121 = vector.load %arg8[%c0_44, %c0_45, %c24] : memref<1x8x32xbf16, #tpu.memory_space<vmem>>, vector<1x8x8xbf16>
    %122 = vector.shape_cast %121 : vector<1x8x8xbf16> to vector<8x8xbf16>
    %123 = vector.shape_cast %120 : vector<8x8xbf16> to vector<1x8x8xbf16>
    tpu.vector_store %arg8[%c0_44, %c0_45, %c24], %123 {strides = array<i32>} : memref<1x8x32xbf16, #tpu.memory_space<vmem>>, vector<1x8x8xbf16>,
    return
  }
  func.func @transform_0(%arg0: i32) -> (i32, i32, i32) {
    %c0_i32 = arith.constant 0 : i32
    %c0_i32_0 = arith.constant 0 : i32
    %c0_i32_1 = arith.constant 0 : i32
    return %arg0, %c0_i32, %c0_i32_0 : i32, i32, i32
  }
  func.func @transform_1(%arg0: i32) -> (i32, i32, i32) {
    %c0_i32 = arith.constant 0 : i32
    %c0_i32_0 = arith.constant 0 : i32
    %c0_i32_1 = arith.constant 0 : i32
    return %arg0, %c0_i32, %c0_i32_0 : i32, i32, i32
  }
  func.func @transform_2(%arg0: i32) -> (i32, i32, i32) {
    %c0_i32 = arith.constant 0 : i32
    %c0_i32_0 = arith.constant 0 : i32
    %c0_i32_1 = arith.constant 0 : i32
    return %arg0, %c0_i32, %c0_i32_0 : i32, i32, i32
  }
  func.func @transform_3(%arg0: i32) -> (i32, i32) {
    %c0_i32 = arith.constant 0 : i32
    %c0_i32_0 = arith.constant 0 : i32
    %c0_i32_1 = arith.constant 0 : i32
    return %c0_i32, %c0_i32_0 : i32, i32
  }
  func.func @transform_4(%arg0: i32) -> (i32, i32) {
    %c0_i32 = arith.constant 0 : i32
    %c0_i32_0 = arith.constant 0 : i32
    %c0_i32_1 = arith.constant 0 : i32
    return %c0_i32, %c0_i32_0 : i32, i32
  }
  func.func @transform_5(%arg0: i32) -> (i32, i32) {
    %c0_i32 = arith.constant 0 : i32
    %c0_i32_0 = arith.constant 0 : i32
    %c0_i32_1 = arith.constant 0 : i32
    return %c0_i32, %c0_i32_0 : i32, i32
  }
  func.func @transform_6(%arg0: i32) -> (i32, i32) {
    %c0_i32 = arith.constant 0 : i32
    %c0_i32_0 = arith.constant 0 : i32
    %c0_i32_1 = arith.constant 0 : i32
    return %c0_i32, %c0_i32_0 : i32, i32
  }
  func.func @transform_7(%arg0: i32) -> (i32, i32, i32) {
    %c0_i32 = arith.constant 0 : i32
    %c0_i32_0 = arith.constant 0 : i32
    %c0_i32_1 = arith.constant 0 : i32
    return %arg0, %c0_i32, %c0_i32_0 : i32, i32, i32
  }
}

module attributes {stable_mosaic.version = 11 : i64} {
  func.func @_ffn_res_ln_kernel(%arg0: i32, %arg1: memref<16x32xbf16, #tpu.memory_space<vmem>>, %arg2: memref<32x64xbf16, #tpu.memory_space<vmem>>, %arg3: memref<1x64xf32, #tpu.memory_space<vmem>>, %arg4: memref<64x32xbf16, #tpu.memory_space<vmem>>, %arg5: memref<1x32xf32, #tpu.memory_space<vmem>>, %arg6: memref<1x32xf32, #tpu.memory_space<vmem>>, %arg7: memref<1x32xf32, #tpu.memory_space<vmem>>, %arg8: memref<16x32xf32, #tpu.memory_space<vmem>>) attributes {dimension_semantics = [#tpu.dimension_semantics<parallel>], iteration_bounds = array<i64: 1>, scalar_prefetch = 0 : i64, scratch_operands = 0 : i64, tpu.core_type = #tpu.core_type<tc>, window_params = [{transform_indices = @transform_0, window_bounds = array<i64: 16, 32>}, {pipeline_mode = #tpu.pipeline_mode<synchronous>, transform_indices = @transform_1, window_bounds = array<i64: 32, 64>}, {pipeline_mode = #tpu.pipeline_mode<synchronous>, transform_indices = @transform_2, window_bounds = array<i64: 1, 64>}, {pipeline_mode = #tpu.pipeline_mode<synchronous>, transform_indices = @transform_3, window_bounds = array<i64: 64, 32>}, {pipeline_mode = #tpu.pipeline_mode<synchronous>, transform_indices = @transform_4, window_bounds = array<i64: 1, 32>}, {pipeline_mode = #tpu.pipeline_mode<synchronous>, transform_indices = @transform_5, window_bounds = array<i64: 1, 32>}, {pipeline_mode = #tpu.pipeline_mode<synchronous>, transform_indices = @transform_6, window_bounds = array<i64: 1, 32>}, {transform_indices = @transform_7, window_bounds = array<i64: 16, 32>}]} {
    %c0 = arith.constant 0 : index
    %c0_0 = arith.constant 0 : index
    %0 = vector.load %arg1[%c0, %c0_0] : memref<16x32xbf16, #tpu.memory_space<vmem>>, vector<16x32xbf16>
    %1 = arith.extf %0 : vector<16x32xbf16> to vector<16x32xf32>
    %c0_1 = arith.constant 0 : index
    %c0_2 = arith.constant 0 : index
    %2 = vector.load %arg1[%c0_1, %c0_2] : memref<16x32xbf16, #tpu.memory_space<vmem>>, vector<16x32xbf16>
    %c0_3 = arith.constant 0 : index
    %c0_4 = arith.constant 0 : index
    %3 = vector.load %arg2[%c0_3, %c0_4] : memref<32x64xbf16, #tpu.memory_space<vmem>>, vector<32x64xbf16>
    %cst = arith.constant dense<0.000000e+00> : vector<16x64xf32>
    %4 = tpu.matmul %2, %3, %cst {dimension_numbers = #tpu.dot_dimension_numbers<[1], [0], [0], [1], [0, 0, 1, 1], [], []>} : vector<16x32xbf16>, vector<32x64xbf16>, vector<16x64xf32> -> vector<16x64xf32>
    %c0_5 = arith.constant 0 : index
    %c0_6 = arith.constant 0 : index
    %5 = vector.load %arg3[%c0_5, %c0_6] : memref<1x64xf32, #tpu.memory_space<vmem>>, vector<1x64xf32>
    %6 = vector.broadcast %5 : vector<1x64xf32> to vector<16x64xf32>
    %7 = arith.addf %4, %6 : vector<16x64xf32>
    %cst_7 = arith.constant 0.000000e+00 : f32
    %8 = vector.broadcast %cst_7 : f32 to vector<16x64xf32>
    %9 = arith.maximumf %7, %8 : vector<16x64xf32>
    %10 = arith.truncf %9 : vector<16x64xf32> to vector<16x64xbf16>
    %c0_8 = arith.constant 0 : index
    %c0_9 = arith.constant 0 : index
    %11 = vector.load %arg4[%c0_8, %c0_9] : memref<64x32xbf16, #tpu.memory_space<vmem>>, vector<64x32xbf16>
    %cst_10 = arith.constant dense<0.000000e+00> : vector<16x32xf32>
    %12 = tpu.matmul %10, %11, %cst_10 {dimension_numbers = #tpu.dot_dimension_numbers<[1], [0], [0], [1], [0, 0, 1, 1], [], []>} : vector<16x64xbf16>, vector<64x32xbf16>, vector<16x32xf32> -> vector<16x32xf32>
    %c0_11 = arith.constant 0 : index
    %c0_12 = arith.constant 0 : index
    %13 = vector.load %arg5[%c0_11, %c0_12] : memref<1x32xf32, #tpu.memory_space<vmem>>, vector<1x32xf32>
    %14 = vector.broadcast %13 : vector<1x32xf32> to vector<16x32xf32>
    %15 = arith.addf %12, %14 : vector<16x32xf32>
    %16 = arith.addf %15, %1 : vector<16x32xf32>
    %cst_13 = arith.constant dense<0.000000e+00> : vector<16xf32>
    %17 = vector.multi_reduction <add>, %16, %cst_13 [1] : vector<16x32xf32> to vector<16xf32>
    %18 = vector.shape_cast %17 : vector<16xf32> to vector<16x1xf32>
    %cst_14 = arith.constant 3.200000e+01 : f32
    %19 = vector.broadcast %cst_14 : f32 to vector<16x1xf32>
    %20 = arith.divf %18, %19 : vector<16x1xf32>
    %21 = vector.broadcast %20 : vector<16x1xf32> to vector<16x32xf32>
    %22 = arith.subf %16, %21 : vector<16x32xf32>
    %23 = arith.mulf %22, %22 : vector<16x32xf32>
    %cst_15 = arith.constant dense<0.000000e+00> : vector<16xf32>
    %24 = vector.multi_reduction <add>, %23, %cst_15 [1] : vector<16x32xf32> to vector<16xf32>
    %25 = vector.shape_cast %24 : vector<16xf32> to vector<16x1xf32>
    %cst_16 = arith.constant 3.200000e+01 : f32
    %26 = vector.broadcast %cst_16 : f32 to vector<16x1xf32>
    %27 = arith.divf %25, %26 : vector<16x1xf32>
    %28 = vector.broadcast %20 : vector<16x1xf32> to vector<16x32xf32>
    %29 = arith.subf %16, %28 : vector<16x32xf32>
    %cst_17 = arith.constant 9.99999974E-6 : f32
    %30 = vector.broadcast %cst_17 : f32 to vector<16x1xf32>
    %31 = arith.addf %27, %30 : vector<16x1xf32>
    %32 = math.rsqrt %31 : vector<16x1xf32>
    %33 = vector.broadcast %32 : vector<16x1xf32> to vector<16x32xf32>
    %34 = arith.mulf %29, %33 : vector<16x32xf32>
    %c0_18 = arith.constant 0 : index
    %c0_19 = arith.constant 0 : index
    %35 = vector.load %arg6[%c0_18, %c0_19] : memref<1x32xf32, #tpu.memory_space<vmem>>, vector<1x32xf32>
    %36 = vector.broadcast %35 : vector<1x32xf32> to vector<16x32xf32>
    %37 = arith.mulf %34, %36 : vector<16x32xf32>
    %c0_20 = arith.constant 0 : index
    %c0_21 = arith.constant 0 : index
    %38 = vector.load %arg7[%c0_20, %c0_21] : memref<1x32xf32, #tpu.memory_space<vmem>>, vector<1x32xf32>
    %39 = vector.broadcast %38 : vector<1x32xf32> to vector<16x32xf32>
    %40 = arith.addf %37, %39 : vector<16x32xf32>
    %c0_22 = arith.constant 0 : index
    %c0_23 = arith.constant 0 : index
    %41 = vector.load %arg8[%c0_22, %c0_23] : memref<16x32xf32, #tpu.memory_space<vmem>>, vector<16x32xf32>
    tpu.vector_store %arg8[%c0_22, %c0_23], %40 {strides = array<i32>} : memref<16x32xf32, #tpu.memory_space<vmem>>, vector<16x32xf32>,
    return
  }
  func.func @transform_0(%arg0: i32) -> (i32, i32) {
    %c0_i32 = arith.constant 0 : i32
    %c0_i32_0 = arith.constant 0 : i32
    return %arg0, %c0_i32 : i32, i32
  }
  func.func @transform_1(%arg0: i32) -> (i32, i32) {
    %c0_i32 = arith.constant 0 : i32
    %c0_i32_0 = arith.constant 0 : i32
    %c0_i32_1 = arith.constant 0 : i32
    return %c0_i32, %c0_i32_0 : i32, i32
  }
  func.func @transform_2(%arg0: i32) -> (i32, i32) {
    %c0_i32 = arith.constant 0 : i32
    %c0_i32_0 = arith.constant 0 : i32
    %c0_i32_1 = arith.constant 0 : i32
    return %c0_i32, %c0_i32_0 : i32, i32
  }
  func.func @transform_3(%arg0: i32) -> (i32, i32) {
    %c0_i32 = arith.constant 0 : i32
    %c0_i32_0 = arith.constant 0 : i32
    %c0_i32_1 = arith.constant 0 : i32
    return %c0_i32, %c0_i32_0 : i32, i32
  }
  func.func @transform_4(%arg0: i32) -> (i32, i32) {
    %c0_i32 = arith.constant 0 : i32
    %c0_i32_0 = arith.constant 0 : i32
    %c0_i32_1 = arith.constant 0 : i32
    return %c0_i32, %c0_i32_0 : i32, i32
  }
  func.func @transform_5(%arg0: i32) -> (i32, i32) {
    %c0_i32 = arith.constant 0 : i32
    %c0_i32_0 = arith.constant 0 : i32
    %c0_i32_1 = arith.constant 0 : i32
    return %c0_i32, %c0_i32_0 : i32, i32
  }
  func.func @transform_6(%arg0: i32) -> (i32, i32) {
    %c0_i32 = arith.constant 0 : i32
    %c0_i32_0 = arith.constant 0 : i32
    %c0_i32_1 = arith.constant 0 : i32
    return %c0_i32, %c0_i32_0 : i32, i32
  }
  func.func @transform_7(%arg0: i32) -> (i32, i32) {
    %c0_i32 = arith.constant 0 : i32
    %c0_i32_0 = arith.constant 0 : i32
    return %arg0, %c0_i32 : i32, i32
  }
}

</mosaic_0001>

<bundles_post_ra>
// kernel: decoder_layer.6
= control target key start
LH: loop header
LB: loop body
LE: loop exit
PB: predicated region body
PF: predicated region fallthrough
CT: control target
= control target key end

     0   :  { %v200_v0 = vmov 0.0   ;;  %vm201_vm0 = vmmov 0   ;;  %vm54_vm1 = vcmask 261120   ;;  %vm158_vm2 = vcmask 257024   ;;  %s269_s2 = inlined_call_operand.vmem [shape: bf16[32,32], index: 2, kind: input, shape index: {}]   ;;  %s270_s0 = inlined_call_operand.vmem [shape: bf16[16,32], index: 0, kind: input, shape index: {}]   ;;  %s271_s1 = inlined_call_operand.vmem [shape: bf16[16,32], index: 1, kind: input, shape index: {}]   ;;  %s272_s3 = inlined_call_operand.vmem [shape: f32[1,32], index: 3, kind: input, shape index: {}]   ;;  %s273_s4 = inlined_call_operand.vmem [shape: f32[1,32], index: 4, kind: input, shape index: {}]   ;;  %s274_s5 = inlined_call_operand.vmem [shape: f32[1,32], index: 5, kind: input, shape index: {}]   ;;  %s275_s6 = inlined_call_operand.vmem [shape: bf16[16,32], index: 6, kind: output, shape index: {}]  }
   0x1   :  { %183 = vmatprep.subr.bf16.mxu0 %v200_v0  ;;  %v193_v1 = vld [vmem:[%s269_s2 + $0x8] sm:$0xff]   ;;  %187 = vmatprep.mubr.msk.bf16.mxu0 %vm201_vm0, %v200_v0  ;;  %v194_v2 = vld [vmem:[%s269_s2] sm:$0xff]  }
   0x2   :  { %184 = vmatpush3.bf16.msra.mxu0 %v193_v1  ;;  %v195_v3 = vld [vmem:[%s270_s0] sm:$0xff]  }
   0x3   :  { %185 = vmatprep.subr.bf16.mxu0 %v200_v0  ;;  %v177_v4 = vld [vmem:[%s271_s1] sm:$0xff]  }
   0x4   :  { %v165_v5 = vld [vmem:[%s272_s3] ss:$0 sm:$0xff]  ;;  %v178_v6 = vunpack.c.l.bf16 %v177_v4  ;;  %v179_v11 = vunpack.c.h.bf16 %v177_v4 }
   0x5   :  { %v170_v35 = vld [vmem:[%s273_s4] ss:$0 sm:$0xff] }
   0x6   :  { %186 = vmatpush3.bf16.msra.mxu0 %v194_v2  ;;  %v171_v37 = vld [vmem:[%s274_s5] ss:$0 sm:$0xff] }
   0x9   :  { %188 = vmatmul.mubr.msk.bf16.vlgmr.msra.gmra.mxu0 %vm54_vm1, %v195_v3 }
  0xc9   :  { %v92_v7 = vpop.f32.mrf.mxu0 }
  0xca   :  { %v93_v8 = vadd.f32 %v165_v5, %v92_v7 }
  0xcb   :  { %v189_v9 = vpop.f32.mrf.mxu0 }
  0xcc   :  { %v103_v10 = vadd.f32 %v178_v6, %v93_v8 }
  0xcd   :  { %v95_v12 = vpop.f32.mrf.mxu0 }
  0xce   :  { %v96_v13 = vadd.f32 %v165_v5, %v95_v12  ;;  %v105_v14 = vsel %vm54_vm1, %v103_v10, 0.0 }
  0xcf   :  { %106 = vadd.xlane.f32.xlu0 %v105_v14  ;;  %v190_v15 = vpop.f32.mrf.mxu0 }
  0xd0   :  { %v104_v16 = vadd.f32 %v179_v11, %v96_v13 }
  0xd2   :  { %v108_v17 = vsel %vm54_vm1, %v104_v16, 0.0 }
  0xd3   :  { %109 = vadd.xlane.f32.xlu0 %v108_v17 }
 0x158   :  { %v107_v18 = vpop.xlane.xlu0 %106 }
 0x159   :  { %v112_v19 = vmul.f32 0.03125, %v107_v18 }
 0x15b   :  { %v114_v20 = vsub.f32 %v103_v10, %v112_v19 }
 0x15c   :  { %v110_v21 = vpop.xlane.xlu0 %109 }
 0x15d   :  { %v113_v22 = vmul.f32 0.03125, %v110_v21  ;;  %v116_v23 = vmul.f32 %v114_v20, %v114_v20 }
 0x15f   :  { %v115_v24 = vsub.f32 %v104_v16, %v113_v22  ;;  %v118_v25 = vsel %vm54_vm1, %v116_v23, 0.0 }
 0x160   :  { %119 = vadd.xlane.f32.xlu1 %v118_v25 }
 0x161   :  { %v117_v26 = vmul.f32 %v115_v24, %v115_v24 }
 0x163   :  { %v121_v27 = vsel %vm54_vm1, %v117_v26, 0.0 }
 0x164   :  { %122 = vadd.xlane.f32.xlu1 %v121_v27 }
 0x1e9   :  { %v120_v28 = vpop.xlane.xlu1 %119 }
 0x1ea   :  { %v124_v29 = vmul.f32 0.03125, %v120_v28 }
 0x1ec   :  { %v126_v30 = vadd.f32 1e-05, %v124_v29 }
 0x1ed   :  { %v123_v31 = vpop.xlane.xlu1 %122 }
 0x1ee   :  { %196 = vrsqrt.f32 %v126_v30  ;;  %v125_v32 = vmul.f32 0.03125, %v123_v31 }
 0x1f0   :  { %v127_v33 = vadd.f32 1e-05, %v125_v32 }
 0x1f2   :  { %198 = vrsqrt.f32 %v127_v33 }
 0x1fb   :  { %v197_v34 = vpop.eup %196 }
 0x1fc   :  { %v130_v36 = vmul.f32 %v197_v34, %v114_v20 }
 0x1fe   :  { %v139_v38 = vmul.f32 %v170_v35, %v130_v36 }
 0x1ff   :  { %v199_v39 = vpop.eup %198 }
 0x200   :  { %v148_v40 = vadd.f32 %v171_v37, %v139_v38  ;;  %v131_v41 = vmul.f32 %v199_v39, %v115_v24 }
 0x202   :  { %v174_v42 = vpack.c.bf16 %v148_v40, %v148_v40  ;;  %v140_v43 = vmul.f32 %v170_v35, %v131_v41 }
 0x204   :  { %159 = vst.msk [vmem:[%s275_s6] sm:$0xf] %vm158_vm2, %v174_v42  ;;  %v149_v44 = vadd.f32 %v171_v37, %v140_v43 }
 0x206   :  { %v175_v45 = vpack.c.bf16 %v149_v44, %v149_v44 }
 0x208   :  { %160 = vst.msk [vmem:[%s275_s6 + $0x4] sm:$0xf] %vm158_vm2, %v175_v45 }

// kernel: decoder_layer.5
= control target key start
LH: loop header
LB: loop body
LE: loop exit
PB: predicated region body
PF: predicated region fallthrough
CT: control target
= control target key end

     0   :  { %s1048_s18 = smov 0   ;;  %s1156_s0 = inlined_call_operand.vmem [shape: bf16[2,8,32], index: 0, kind: input, shape index: {}]   ;;  %s1157_s1 = inlined_call_operand.vmem [shape: f32[8,8], index: 1, kind: input, shape index: {}]   ;;  %s1158_s2 = inlined_call_operand.vmem [shape: f32[2,1,8], index: 2, kind: input, shape index: {}]   ;;  %s1159_s3 = inlined_call_operand.vmem [shape: bf16[32,96], index: 3, kind: input, shape index: {}]   ;;  %s1160_s4 = inlined_call_operand.vmem [shape: f32[1,96], index: 4, kind: input, shape index: {}]   ;;  %s1161_s5 = inlined_call_operand.vmem [shape: bf16[2,8,32], index: 5, kind: output, shape index: {}]  }
   0x1 LB: > { %s849_s19 = sadd.s32 4294967295, %s1000_s18   ;;  %p853_p0 = scmp.ge.s32.totalorder %s1000_s18, 1  ;;  %s1000_s18 = sphi %s1048_s18, %s15_s18  }
   0x2   : > { %p194_p1 = scmp.lt.s32.totalorder %s1000_s18, 3 }
   0x4   : > { %p195_p2 = pnand %p853_p0, %p194_p1 }
   0x5   : > { %p223_p3 = scmp.lt.s32.totalorder (!%p195_p2), %s849_s19, 1  ;;  %s1004_s30 = smov (!%p195_p2), 96  }
   0x6   : > { %198 = sbr.rel (%p195_p2) target bundleno = 1060 (0x424), region = 40  ;;  %s1005_s6 = smov (!%p195_p2), 120  }
   0x7   : > { %s1006_s7 = smov (!%p195_p2), 88   ;;  %s1007_s8 = smov (!%p195_p2), 80  }
   0x8   : > { %s1008_s9 = smov (!%p195_p2), 112   ;;  %s1009_s10 = smov (!%p195_p2), 72  }
   0x9   : > { %s1010_s11 = smov (!%p195_p2), 104   ;;  %s1011_s17 = smov (!%p195_p2), 56  }
   0xa   : > { %s1012_s20 = smov (!%p195_p2), 64   ;;  %s1013_s21 = smov (!%p195_p2), 40  }
   0xb   : > { %v976_v0 = vld [vmem:[%s1159_s3 + $0x8] sm:$0xff]   ;;  %v1002_v1 = vmov 0.0   ;;  %v977_v2 = vld [vmem:[%s1159_s3] sm:$0xff]   ;;  %vm1003_vm0 = vmmov 0   ;;  %s1163_s19 = smov (!%p223_p3, %s849_s19), 1  ;;  %vm259_vm1 = vcmask 261120  }
   0xc   : > { %896 = vmatprep.subr.bf16.mxu0 %v1002_v1  ;;  %904 = vmatprep.subr.bf16.mxu1 %v1002_v1  ;;  %s854_s24 = sshll.u32 %s1163_s19, 2  ;;  %v856_v4 = vld [vmem:[%s1160_s4] ss:$0 sm:$0xff]  ;;  %vm318_vm2 = vcmask 64512   ;;  %s229_s14 = scalar_lea.vmem %s1158_s2, %s1163_s19  ;;  %vm380_vm3 = vcmask 1043456   ;;  %vm427_vm4 = vcmask 60416  }
   0xd   : > { %897 = vmatpush3.bf16.msra.mxu0 %v976_v0  ;;  %900 = vmatprep.mubr.msk.bf16.mxu0 %vm1003_vm0, %v1002_v1  ;;  %s226_s27 = scalar_lea.vmem %s1156_s0, %s854_s24  ;;  %v860_v24 = vld [vmem:[%s229_s14] ss:$0 sm:$0xff]  ;;  %s1014_s22 = smov 48   ;;  %vm547_vm5 = vcmask 126016   ;;  %vm666_vm6 = vcmask 191616   ;;  %vm785_vm7 = vcmask 257216  }
   0xe   : > { %898 = vmatprep.subr.bf16.mxu0 %v1002_v1  ;;  %906 = vmatprep.mubr.msk.bf16.mxu1 %vm1003_vm0, %v1002_v1  ;;  %v235_v3 = vld [vmem:[%s226_s27] sm:$0xf]  ;;  %s1147_s26 = scalar_lea.vmem %s1161_s5, %s854_s24  ;;  %s1015_s27 = smov 8  }
   0xf   : > { %v303_v25 = vld [vmem:[%s1157_s1] sm:$0xff]  ;;  %s1016_s19 = smov 16   ;;  %s1017_s24 = smov 24  }
  0x10   : > { %v311_v26 = vadd.f32 %v860_v24, %v303_v25 }
  0x11   : > { %899 = vmatpush3.bf16.msra.mxu0 %v977_v2 }
  0x12   : > { %910 = vmatprep.subr.bf16.mxu0 %v1002_v1 }
  0x14   : > { %901 = vmatmul.mubr.msk.bf16.vlgmr.msra.gmra.mxu0 %vm259_vm1, %v235_v3 }
  0x15   : > { %912 = vmatprep.mubr.msk.bf16.mxu0 %vm1003_vm0, %v1002_v1 }
  0xd4   : > { %v297_v5 = vpop.f32.mrf.mxu0 }
  0xd5   : > { %v298_v6 = vadd.f32 %v856_v4, %v297_v5 }
  0xd6   : > { %v902_v7 = vpop.f32.mrf.mxu0 }
  0xd7   : > { %v312_v8 = vmul.f32 0.35355338, %v298_v6  ;;  %v1083_v9 = vpack.c.bf16 %v298_v6, %v298_v6 }
  0xd8   : > { %v300_v10 = vpop.f32.mrf.mxu0 }
  0xd9   : > { %v313_v11 = vpack.c.bf16 %v312_v8, %v312_v8  ;;  %316 = vrot.lane.b32.xlu0 %v1083_v9, %s1004_s30 }
  0xda   : > { %v903_v12 = vpop.f32.mrf.mxu0 }
  0xdb   : > { %430 = vrot.lane.b32.xlu1 %v313_v11, %s1005_s6 }
  0xdd   : > { %432 = vrot.lane.b32.xlu0 %v1083_v9, %s1006_s7 }
  0xdf   : > { %551 = vrot.lane.b32.xlu1 %v1083_v9, %s1007_s8 }
  0xe1   : > { %549 = vrot.lane.b32.xlu0 %v313_v11, %s1008_s9 }
  0xe3   : > { %670 = vrot.lane.b32.xlu1 %v1083_v9, %s1009_s10 }
  0xe5   : > { %668 = vrot.lane.b32.xlu0 %v313_v11, %s1010_s11 }
 0x14b   : > { %v317_v13 = vpop.permute.xlu0 %316 }
 0x14c   : > { %v323_v14 = vsel %vm318_vm2, %v317_v13, 0 }
 0x14d   : > { %905 = vmatpush3.bf16.xpose.msra.mxu1 %v323_v14  ;;  %v431_v16 = vpop.permute.xlu1 %430 }
 0x14e   : > { %916 = vmatprep.subr.bf16.mxu1 %v1002_v1 }
 0x14f   : > { %v433_v15 = vpop.permute.xlu0 %432 }
 0x150   : > { %v438_v17 = vsel %vm318_vm2, %v433_v15, 0 }
 0x151   : > { %v552_v18 = vpop.permute.xlu1 %551 }
 0x152   : > { %v557_v19 = vsel %vm318_vm2, %v552_v18, 0 }
 0x153   : > { %v550_v21 = vpop.permute.xlu0 %549 }
 0x154   : > { %907 = vmatmul.mubr.msk.bf16.vlgmr.msra.gmra.mxu1 %vm318_vm2, %v313_v11 }
 0x155   : > { %917 = vmatpush3.bf16.xpose.msra.mxu1 %v438_v17  ;;  %918 = vmatprep.mubr.msk.bf16.mxu1 %vm1003_vm0, %v1002_v1  ;;  %v671_v20 = vpop.permute.xlu1 %670 }
 0x156   : > { %928 = vmatprep.subr.bf16.mxu1 %v1002_v1  ;;  %v676_v22 = vsel %vm318_vm2, %v671_v20, 0 }
 0x157   : > { %v669_v23 = vpop.permute.xlu0 %668 }
 0x15c   : > { %919 = vmatmul.mubr.msk.bf16.vlgmr.msra.gmra.mxu1 %vm318_vm2, %v431_v16 }
 0x15d   : > { %929 = vmatpush3.bf16.xpose.msra.mxu1 %v557_v19  ;;  %930 = vmatprep.mubr.msk.bf16.mxu1 %vm1003_vm0, %v1002_v1 }
 0x15e   : > { %940 = vmatprep.subr.bf16.mxu1 %v1002_v1 }
 0x164   : > { %931 = vmatmul.mubr.msk.bf16.vlgmr.msra.gmra.mxu1 %vm318_vm2, %v550_v21 }
 0x165   : > { %941 = vmatpush3.bf16.xpose.msra.mxu1 %v676_v22  ;;  %942 = vmatprep.mubr.msk.bf16.mxu1 %vm1003_vm0, %v1002_v1 }
 0x16c   : > { %943 = vmatmul.mubr.msk.bf16.vlgmr.msra.gmra.mxu1 %vm318_vm2, %v669_v23 }
 0x214   : > { %v359_v27 = vpop.f32.mrf.mxu1 }
 0x215   : > { %v360_v28 = vadd.f32 %v359_v27, %v311_v26 }
 0x216   : > { %v908_v29 = vpop.f32.mrf.mxu1 }
 0x217   : > { %v365_v30 = vsel %vm318_vm2, %v360_v28, -inf }
 0x218   : > { %366 = vmax.xlane.f32.xlu1 %v365_v30  ;;  %v362_v31 = vpop.f32.mrf.mxu1 }
 0x21a   : > { %v909_v32 = vpop.f32.mrf.mxu1 }
 0x21c   : > { %v474_v33 = vpop.f32.mrf.mxu1 }
 0x21d   : > { %v475_v34 = vadd.f32 %v474_v33, %v311_v26 }
 0x21e   : > { %v920_v35 = vpop.f32.mrf.mxu1 }
 0x21f   : > { %v480_v36 = vsel %vm318_vm2, %v475_v34, -inf }
 0x220   : > { %481 = vmax.xlane.f32.xlu0 %v480_v36  ;;  %v477_v37 = vpop.f32.mrf.mxu1 }
 0x222   : > { %v921_v38 = vpop.f32.mrf.mxu1 }
 0x224   : > { %v593_v39 = vpop.f32.mrf.mxu1 }
 0x225   : > { %v594_v40 = vadd.f32 %v593_v39, %v311_v26 }
 0x226   : > { %v932_v41 = vpop.f32.mrf.mxu1 }
 0x227   : > { %v599_v42 = vsel %vm318_vm2, %v594_v40, -inf }
 0x228   : > { %600 = vmax.xlane.f32.xlu0 %v599_v42  ;;  %v596_v43 = vpop.f32.mrf.mxu1 }
 0x229   : > { %490 = vrot.lane.b32.xlu1 %v1083_v9, %s1011_s17 }
 0x22a   : > { %v933_v44 = vpop.f32.mrf.mxu1 }
 0x22c   : > { %v712_v45 = vpop.f32.mrf.mxu1 }
 0x22d   : > { %v713_v49 = vadd.f32 %v712_v45, %v311_v26 }
 0x22e   : > { %v944_v46 = vpop.f32.mrf.mxu1 }
 0x22f   : > { %v718_v50 = vsel %vm318_vm2, %v713_v49, -inf }
 0x230   : > { %v715_v47 = vpop.f32.mrf.mxu1 }
 0x232   : > { %v945_v48 = vpop.f32.mrf.mxu1 }
 0x23e   : > { %375 = vrot.lane.b32.xlu0 %v1083_v9, %s1012_s20 }
 0x242   : > { %728 = vrot.lane.b32.xlu0 %v1083_v9, %s1013_s21 }
 0x24d   : > { %719 = vmax.xlane.f32.xlu1 %v718_v50 }
 0x25e   : > { %609 = vrot.lane.b32.xlu1 %v1083_v9, %s1014_s22 }
 0x2a1   : > { %v367_v51 = vpop.xlane.xlu1 %366 }
 0x2a2   : > { %v368_v52 = vsub.f32 %v360_v28, %v367_v51 }
 0x2a4   : > { %v369_v53 = vmul.f32 1.442695, %v368_v52 }
 0x2a5   : > { %v491_v63 = vpop.permute.xlu1 %490 }
 0x2a6   : > { %978 = vpow2.f32 %v369_v53  ;;  %v496_v2 = vsel %vm380_vm3, %v491_v63, 0 }
 0x2a9   : > { %v482_v54 = vpop.xlane.xlu0 %481 }
 0x2aa   : > { %v483_v55 = vsub.f32 %v475_v34, %v482_v54 }
 0x2ac   : > { %v484_v56 = vmul.f32 1.442695, %v483_v55 }
 0x2ae   : > { %980 = vpow2.f32 %v484_v56 }
 0x2b1   : > { %v601_v57 = vpop.xlane.xlu0 %600 }
 0x2b2   : > { %v602_v58 = vsub.f32 %v594_v40, %v601_v57 }
 0x2b3   : > { %v979_v60 = vpop.eup %978 }
 0x2b4   : > { %v603_v59 = vmul.f32 1.442695, %v602_v58  ;;  %v374_v0 = vpack.c.bf16 %v979_v60, %v979_v60  ;;  %v371_v5 = vsel %vm318_vm2, %v979_v60, 0.0 }
 0x2b5   : > { %v376_v61 = vpop.permute.xlu0 %375 }
 0x2b6   : > { %982 = vpow2.f32 %v603_v59  ;;  %v382_v62 = vsel %vm380_vm3, %v376_v61, 0 }
 0x2b7   : > { %911 = vmatpush3.bf16.msra.mxu0 %v382_v62 }
 0x2b8   : > { %922 = vmatprep.subr.bf16.mxu0 %v1002_v1 }
 0x2b9   : > { %v729_v14 = vpop.permute.xlu0 %728 }
 0x2ba   : > { %913 = vmatmul.mubr.msk.bf16.vlgmr.msra.gmra.mxu0 %vm318_vm2, %v374_v0  ;;  %v734_v16 = vsel %vm380_vm3, %v729_v14, 0 }
 0x2bb   : > { %v981_v3 = vpop.eup %980  ;;  %923 = vmatpush3.bf16.msra.mxu0 %v496_v2  ;;  %924 = vmatprep.mubr.msk.bf16.mxu0 %vm1003_vm0, %v1002_v1 }
 0x2bc   : > { %v486_v4 = vsel %vm318_vm2, %v981_v3, 0.0  ;;  %934 = vmatprep.subr.bf16.mxu0 %v1002_v1  ;;  %v489_v6 = vpack.c.bf16 %v981_v3, %v981_v3 }
 0x2bd   : > { %487 = vadd.xlane.f32.xlu1 %v486_v4 }
 0x2c1   : > { %372 = vadd.xlane.f32.xlu1 %v371_v5 }
 0x2c2   : > { %925 = vmatmul.mubr.msk.bf16.vlgmr.msra.gmra.mxu0 %vm318_vm2, %v489_v6 }
 0x2c3   : > { %v983_v7 = vpop.eup %982  ;;  %936 = vmatprep.mubr.msk.bf16.mxu0 %vm1003_vm0, %v1002_v1 }
 0x2c4   : > { %v605_v8 = vsel %vm318_vm2, %v983_v7, 0.0  ;;  %v608_v15 = vpack.c.bf16 %v983_v7, %v983_v7 }
 0x2c5   : > { %606 = vadd.xlane.f32.xlu0 %v605_v8 }
 0x2d6   : > { %v720_v9 = vpop.xlane.xlu1 %719 }
 0x2d7   : > { %v721_v10 = vsub.f32 %v713_v49, %v720_v9 }
 0x2d9   : > { %v722_v11 = vmul.f32 1.442695, %v721_v10 }
 0x2da   : > { %v610_v12 = vpop.permute.xlu1 %609 }
 0x2db   : > { %984 = vpow2.f32 %v722_v11  ;;  %v615_v13 = vsel %vm380_vm3, %v610_v12, 0 }
 0x2dc   : > { %935 = vmatpush3.bf16.msra.mxu0 %v615_v13 }
 0x2dd   : > { %946 = vmatprep.subr.bf16.mxu0 %v1002_v1 }
 0x2df   : > { %937 = vmatmul.mubr.msk.bf16.vlgmr.msra.gmra.mxu0 %vm318_vm2, %v608_v15 }
 0x2e0   : > { %947 = vmatpush3.bf16.msra.mxu0 %v734_v16  ;;  %948 = vmatprep.mubr.msk.bf16.mxu0 %vm1003_vm0, %v1002_v1 }
 0x2e8   : > { %v985_v17 = vpop.eup %984 }
 0x2e9   : > { %v724_v18 = vsel %vm318_vm2, %v985_v17, 0.0  ;;  %v727_v19 = vpack.c.bf16 %v985_v17, %v985_v17 }
 0x2ea   : > { %725 = vadd.xlane.f32.xlu0 %v724_v18 }
 0x2eb   : > { %949 = vmatmul.mubr.msk.bf16.vlgmr.msra.gmra.mxu0 %vm318_vm2, %v727_v19 }
 0x346   : > { %v488_v20 = vpop.xlane.xlu1 %487 }
 0x34a   : > { %v373_v21 = vpop.xlane.xlu1 %372 }
 0x34b   : > { %986 = vrcp.f32 %v373_v21 }
 0x34c   : > { %988 = vrcp.f32 %v488_v20 }
 0x34e   : > { %v607_v35 = vpop.xlane.xlu0 %606 }
 0x34f   : > { %990 = vrcp.f32 %v607_v35 }
 0x358   : > { %v987_v22 = vpop.eup %986 }
 0x359   : > { %v989_v28 = vpop.eup %988 }
 0x35c   : > { %v991_v37 = vpop.eup %990 }
 0x373   : > { %v726_v36 = vpop.xlane.xlu0 %725 }
 0x374   : > { %992 = vrcp.f32 %v726_v36 }
 0x37a   : > { %v418_v23 = vpop.f32.mrf.mxu0 }
 0x37b   : > { %v425_v24 = vmul.f32 %v987_v22, %v418_v23 }
 0x37c   : > { %v914_v1 = vpop.f32.mrf.mxu0 }
 0x37d   : > { %v426_v25 = vpack.c.bf16 %v425_v24, %v425_v24 }
 0x37e   : > { %v421_v26 = vpop.f32.mrf.mxu0 }
 0x37f   : > { %428 = vst.msk [vmem:[%s1147_s26] sm:$0xf] %vm427_vm4, %v426_v25 }
 0x380   : > { %v915_v27 = vpop.f32.mrf.mxu0 }
 0x381   : > { %v993_v44 = vpop.eup %992 }
 0x382   : > { %v532_v29 = vpop.f32.mrf.mxu0 }
 0x383   : > { %v539_v30 = vmul.f32 %v989_v28, %v532_v29 }
 0x384   : > { %v926_v31 = vpop.f32.mrf.mxu0 }
 0x385   : > { %v874_v32 = vpack.c.bf16 %v539_v30, %v539_v30 }
 0x386   : > { %v535_v33 = vpop.f32.mrf.mxu0 }
 0x387   : > { %544 = vrot.lane.b32.xlu0 %v874_v32, %s1015_s27 }
 0x388   : > { %v927_v34 = vpop.f32.mrf.mxu0 }
 0x39f   : > { %v651_v38 = vpop.f32.mrf.mxu0 }
 0x3a0   : > { %v658_v39 = vmul.f32 %v991_v37, %v651_v38 }
 0x3a1   : > { %v938_v40 = vpop.f32.mrf.mxu0 }
 0x3a2   : > { %v875_v41 = vpack.c.bf16 %v658_v39, %v658_v39 }
 0x3a3   : > { %v654_v42 = vpop.f32.mrf.mxu0 }
 0x3a4   : > { %663 = vrot.lane.b32.xlu1 %v875_v41, %s1016_s19 }
 0x3a5   : > { %v939_v43 = vpop.f32.mrf.mxu0 }
 0x3ab   : > { %v770_v45 = vpop.f32.mrf.mxu0 }
 0x3ac   : > { %v777_v46 = vmul.f32 %v993_v44, %v770_v45 }
 0x3ad   : > { %v950_v47 = vpop.f32.mrf.mxu0 }
 0x3ae   : > { %v876_v48 = vpack.c.bf16 %v777_v46, %v777_v46 }
 0x3af   : > { %v773_v49 = vpop.f32.mrf.mxu0 }
 0x3b0   : > { %782 = vrot.lane.b32.xlu1 %v876_v48, %s1017_s24 }
 0x3b1   : > { %v951_v50 = vpop.f32.mrf.mxu0 }
 0x3f9   : > { %v545_v51 = vpop.permute.xlu0 %544 }
 0x3fa   : > { %548 = vst.msk [vmem:[%s1147_s26] sm:$0xf] %vm547_vm5, %v545_v51 }
 0x416   : > { %v664_v52 = vpop.permute.xlu1 %663 }
 0x417   : > { %667 = vst.msk [vmem:[%s1147_s26] sm:$0xf] %vm666_vm6, %v664_v52 }
 0x422   : > { %v783_v53 = vpop.permute.xlu1 %782 }
 0x423   : > { %786 = vst.msk [vmem:[%s1147_s26] sm:$0xf] %vm785_vm7, %v783_v53 }
 0x424 PF: > { %s15_s18 = sadd.s32 1, %s1000_s18  }
 0x425   : > { %p12_p4 = scmp.ge.s32.totalorder %s15_s18, 4  }
 0x427   :  { %14 = sbr.rel (!%p12_p4) target bundleno = 1 (0x1), region = 73 }

// kernel: decoder_layer.9
= control target key start
LH: loop header
LB: loop body
LE: loop exit
PB: predicated region body
PF: predicated region fallthrough
CT: control target
= control target key end

     0   :  { %v337_v1 = vmov 0.0   ;;  %vm338_vm0 = vmmov 0   ;;  %s425_s0 = inlined_call_operand.vmem [shape: bf16[16,32], index: 0, kind: input, shape index: {}]   ;;  %s426_s1 = inlined_call_operand.vmem [shape: bf16[32,64], index: 1, kind: input, shape index: {}]   ;;  %s427_s2 = inlined_call_operand.vmem [shape: f32[1,64], index: 2, kind: input, shape index: {}]   ;;  %s428_s3 = inlined_call_operand.vmem [shape: bf16[64,32], index: 3, kind: input, shape index: {}]   ;;  %s429_s4 = inlined_call_operand.vmem [shape: f32[1,32], index: 4, kind: input, shape index: {}]   ;;  %s430_s5 = inlined_call_operand.vmem [shape: f32[1,32], index: 5, kind: input, shape index: {}]   ;;  %s431_s6 = inlined_call_operand.vmem [shape: f32[1,32], index: 6, kind: input, shape index: {}]   ;;  %s432_s7 = inlined_call_operand.hbm [shape: f32[16,32], index: 7, kind: output, shape index: {}]  }
   0x1   :  { %v303_v0 = vld [vmem:[%s426_s1 + $0x8] sm:$0xff]   ;;  %278 = vmatprep.subr.bf16.mxu0 %v337_v1  ;;  %v304_v2 = vld [vmem:[%s426_s1] sm:$0xff]   ;;  %286 = vmatprep.subr.bf16.mxu1 %v337_v1  ;;  %v306_v4 = vld [vmem:[%s428_s3 + $0x18] sm:$0xff]  }
   0x2   :  { %279 = vmatpush3.bf16.msra.mxu0 %v303_v0  ;;  %282 = vmatprep.mubr.msk.bf16.mxu0 %vm338_vm0, %v337_v1  ;;  %v28_v3 = vld [vmem:[%s425_s0] sm:$0xff]  }
   0x3   :  { %280 = vmatprep.subr.bf16.mxu0 %v337_v1  ;;  %294 = vmatprep.mubr.msk.bf16.mxu1 %vm338_vm0, %v337_v1 }
   0x4   :  { %287 = vmatpush3.bf16.msra.mxu1 %v306_v4 }
   0x5   :  { %12 = vsyncpa [#allocation3], 0  ;;  %vm60_vm1 = vcmask 261120   ;;  %288 = vmatprep.subr.bf16.mxu1 %v337_v1  ;;  %v307_v5 = vld [vmem:[%s428_s3 + $0x10] sm:$0xff]   ;;  %v308_v6 = vld [vmem:[%s428_s3 + $0x8] sm:$0xff]   ;;  %vm147_vm2 = vcmask 523264   ;;  %v30_v19 = vunpack.c.l.bf16 %v28_v3  ;;  %v31_v24 = vunpack.c.h.bf16 %v28_v3 }
   0x6   :  { %281 = vmatpush3.bf16.msra.mxu0 %v304_v2  ;;  %v309_v7 = vld [vmem:[%s428_s3] sm:$0xff]   ;;  %s339_s18 = smov [#allocation2]  }
   0x7   :  { %v257_v8 = vld [vmem:[%s427_s2] ss:$0 sm:$0xff]  ;;  %s246_s19 = sshll.u32 %s339_s18, 4  ;;  %s247_s19 = int_to_ptr.vmem [resolvable:$true] %s246_s19 }
   0x8   :  { %289 = vmatpush3.bf16.msra.mxu1 %v307_v5  ;;  %v262_v18 = vld [vmem:[%s429_s4] ss:$0 sm:$0xff]  ;;  %s315_s20 = scalar_lea.vmem %s247_s19, 256  ;;  %p320_p1 = scmp.lt.s32.totalorder %s247_s19, %s247_s19 }
   0x9   :  { %283 = vmatmul.mubr.msk.bf16.vlgmr.msra.gmra.mxu0 %vm60_vm1, %v28_v3  ;;  %290 = vmatprep.subr.bf16.mxu1 %v337_v1  ;;  %v268_v48 = vld [vmem:[%s430_s5] ss:$0 sm:$0xff]  ;;  %p316_p0 = scmp.ne.s32.totalorder %s247_s19, %s315_s20  ;;  %p321_p2 = scmp.lt.s32.totalorder %s315_s20, %s315_s20 }
   0xa   :  { %v269_v50 = vld [vmem:[%s431_s6] ss:$0 sm:$0xff] }
   0xb   :  { %p322_p3 = por %p321_p2, %p320_p1 }
   0xc   :  { %291 = vmatpush3.bf16.msra.mxu1 %v308_v6 }
   0xd   :  { %292 = vmatprep.subr.bf16.mxu1 %v337_v1  ;;  %p323_p4 = pnand %p322_p3, %p316_p0 }
  0x10   :  { %293 = vmatpush3.bf16.msra.mxu1 %v309_v7 }
  0xc9   :  { %v98_v9 = vpop.f32.mrf.mxu0 }
  0xca   :  { %v99_v11 = vadd.f32 %v257_v8, %v98_v9 }
  0xcb   :  { %v284_v10 = vpop.f32.mrf.mxu0 }
  0xcc   :  { %v105_v15 = vmax.f32 %v99_v11, 0.0 }
  0xcd   :  { %v101_v12 = vpop.f32.mrf.mxu0 }
  0xce   :  { %v102_v13 = vadd.f32 %v257_v8, %v101_v12 }
  0xcf   :  { %v285_v14 = vpop.f32.mrf.mxu0 }
  0xd0   :  { %v106_v16 = vmax.f32 %v102_v13, 0.0 }
  0xd2   :  { %v107_v17 = vpack.c.bf16 %v106_v16, %v105_v15 }
  0xd4   :  { %295 = vmatmul.mubr.msk.bf16.vlgmr.msra.gmra.mxu1 %vm147_vm2, %v107_v17 }
 0x194   :  { %v185_v20 = vpop.f32.mrf.mxu1 }
 0x195   :  { %v186_v21 = vadd.f32 %v262_v18, %v185_v20 }
 0x196   :  { %v296_v22 = vpop.f32.mrf.mxu1 }
 0x197   :  { %v192_v23 = vadd.f32 %v186_v21, %v30_v19 }
 0x198   :  { %v188_v25 = vpop.f32.mrf.mxu1 }
 0x199   :  { %v189_v26 = vadd.f32 %v262_v18, %v188_v25  ;;  %v194_v27 = vsel %vm60_vm1, %v192_v23, 0.0 }
 0x19a   :  { %v297_v28 = vpop.f32.mrf.mxu1  ;;  %195 = vadd.xlane.f32.xlu0 %v194_v27 }
 0x19b   :  { %v193_v29 = vadd.f32 %v189_v26, %v31_v24 }
 0x19d   :  { %v197_v30 = vsel %vm60_vm1, %v193_v29, 0.0 }
 0x19e   :  { %198 = vadd.xlane.f32.xlu0 %v197_v30 }
 0x223   :  { %v196_v31 = vpop.xlane.xlu0 %195 }
 0x224   :  { %v201_v32 = vmul.f32 0.03125, %v196_v31 }
 0x226   :  { %v203_v33 = vsub.f32 %v192_v23, %v201_v32 }
 0x227   :  { %v199_v34 = vpop.xlane.xlu0 %198 }
 0x228   :  { %v202_v35 = vmul.f32 0.03125, %v199_v34  ;;  %v205_v36 = vmul.f32 %v203_v33, %v203_v33 }
 0x22a   :  { %v204_v37 = vsub.f32 %v193_v29, %v202_v35  ;;  %v207_v38 = vsel %vm60_vm1, %v205_v36, 0.0 }
 0x22b   :  { %208 = vadd.xlane.f32.xlu1 %v207_v38 }
 0x22c   :  { %v206_v39 = vmul.f32 %v204_v37, %v204_v37 }
 0x22e   :  { %v210_v40 = vsel %vm60_vm1, %v206_v39, 0.0 }
 0x22f   :  { %211 = vadd.xlane.f32.xlu1 %v210_v40 }
 0x2b4   :  { %v209_v41 = vpop.xlane.xlu1 %208 }
 0x2b5   :  { %v213_v42 = vmul.f32 0.03125, %v209_v41 }
 0x2b7   :  { %v215_v43 = vadd.f32 1e-05, %v213_v42 }
 0x2b8   :  { %v212_v44 = vpop.xlane.xlu1 %211 }
 0x2b9   :  { %311 = vrsqrt.f32 %v215_v43  ;;  %v214_v45 = vmul.f32 0.03125, %v212_v44 }
 0x2bb   :  { %v216_v46 = vadd.f32 1e-05, %v214_v45 }
 0x2bd   :  { %313 = vrsqrt.f32 %v216_v46 }
 0x2c6   :  { %v312_v47 = vpop.eup %311 }
 0x2c7   :  { %v219_v49 = vmul.f32 %v312_v47, %v203_v33 }
 0x2c9   :  { %v228_v51 = vmul.f32 %v268_v48, %v219_v49 }
 0x2ca   :  { %v314_v52 = vpop.eup %313 }
 0x2cb   :  { %v220_v53 = vmul.f32 %v314_v52, %v204_v37  ;;  %v237_v54 = vadd.f32 %v269_v50, %v228_v51 }
 0x2cd   :  { %v229_v55 = vmul.f32 %v268_v48, %v220_v53  ;;  %239 = vst.msk [vmem:[#allocation2] sm:$0xff] %vm60_vm1, %v237_v54 }
 0x2cf   :  { %v238_v56 = vadd.f32 %v269_v50, %v229_v55 }
 0x2d1   :  { %240 = vst.msk [vmem:[#allocation2 + $0x8] sm:$0xff] %vm60_vm1, %v238_v56 }
 0x2d2   :  { %326 = shalt.err (!%p323_p4)
}
 0x2d3   :  { %s340_s5 = smov 128   ;;  %s341_s6 = smov 8  }
 0x2d4   :  { %252 = dma.vmem_to_hbm [thread:$0]  %s247_s19, 256, %s432_s7, [#allocation3], %s340_s5, %s340_s5, %s341_s6  }
 0x2d5   :  { %335 = dma.done.wait [#allocation3], 256  }
 0x2d6   :  { %336 = vsyncadd [#allocation3], 4294967040 }
 0x2d7   :  { %256 = vsyncpa [#allocation3], 1 }

// kernel: decoder_layer.7
= control target key start
LH: loop header
LB: loop body
LE: loop exit
PB: predicated region body
PF: predicated region fallthrough
CT: control target
= control target key end

     0   :  { %s1214_s24 = smov 0   ;;  %s1336_s0 = inlined_call_operand.vmem [shape: bf16[2,8,32], index: 0, kind: input, shape index: {}]   ;;  %s1337_s1 = inlined_call_operand.vmem [shape: bf16[2,8,32], index: 1, kind: input, shape index: {}]   ;;  %s1338_s2 = inlined_call_operand.vmem [shape: f32[2,1,8], index: 2, kind: input, shape index: {}]   ;;  %s1339_s3 = inlined_call_operand.vmem [shape: bf16[32,32], index: 3, kind: input, shape index: {}]   ;;  %s1340_s4 = inlined_call_operand.vmem [shape: f32[1,32], index: 4, kind: input, shape index: {}]   ;;  %s1341_s5 = inlined_call_operand.vmem [shape: bf16[32,64], index: 5, kind: input, shape index: {}]   ;;  %s1342_s6 = inlined_call_operand.vmem [shape: f32[1,64], index: 6, kind: input, shape index: {}]   ;;  %s1343_s7 = inlined_call_operand.vmem [shape: bf16[2,8,32], index: 7, kind: output, shape index: {}]  }
   0x1 LB: > { %s995_s25 = sadd.s32 4294967295, %s1160_s24   ;;  %p999_p0 = scmp.ge.s32.totalorder %s1160_s24, 1  ;;  %s1160_s24 = sphi %s1214_s24, %s17_s24  }
   0x2   : > { %p253_p1 = scmp.lt.s32.totalorder %s1160_s24, 3 }
   0x4   : > { %p254_p2 = pnand %p999_p0, %p253_p1 }
   0x5   : > { %p290_p3 = scmp.lt.s32.totalorder (!%p254_p2), %s995_s25, 1  ;;  %s1164_s22 = smov (!%p254_p2), 112  }
   0x6   : > { %257 = sbr.rel (%p254_p2) target bundleno = 1028 (0x404), region = 48  ;;  %s1165_s23 = smov (!%p254_p2), 120  }
   0x7   : > { %s1166_s26 = smov (!%p254_p2), 104   ;;  %s1167_s27 = smov (!%p254_p2), 96  }
   0x8   : > { %s1169_s8 = smov (!%p254_p2), 72   ;;  %s1170_s9 = smov (!%p254_p2), 88  }
   0x9   : > { %s1173_s15 = smov (!%p254_p2), 24  }
   0xb   : > { %v1134_v0 = vld [vmem:[%s1339_s3 + $0x8] sm:$0xff]   ;;  %v1162_v1 = vmov 0.0   ;;  %v1136_v3 = vld [vmem:[%s1339_s3] sm:$0xff]   ;;  %vm1163_vm0 = vmmov 0   ;;  %s1345_s25 = smov (!%p290_p3, %s995_s25), 1  ;;  %vm330_vm1 = vcmask 261120  }
   0xc   : > { %1050 = vmatprep.subr.bf16.mxu0 %v1162_v1  ;;  %1058 = vmatprep.subr.bf16.mxu1 %v1162_v1  ;;  %v1135_v2 = vld [vmem:[%s1341_s5 + $0x8] sm:$0xff]   ;;  %v1137_v4 = vld [vmem:[%s1341_s5] sm:$0xff]   ;;  %s1245_s11 = sshll.u32 %s1345_s25, 2  ;;  %vm451_vm2 = vcmask 64512   ;;  %vm514_vm3 = vcmask 1043456   ;;  %s300_s30 = scalar_lea.vmem %s1338_s2, %s1345_s25  ;;  %vm561_vm4 = vcmask 60416  }
   0xd   : > { %1051 = vmatpush3.bf16.msra.mxu0 %v1134_v0  ;;  %1054 = vmatprep.mubr.msk.bf16.mxu0 %vm1163_vm0, %v1162_v1  ;;  %s293_s14 = scalar_lea.vmem %s1336_s0, %s1245_s11  ;;  %s297_s17 = scalar_lea.vmem %s1337_s1, %s1245_s11  ;;  %v1003_v7 = vld [vmem:[%s1340_s4] ss:$0 sm:$0xff]  ;;  %vm681_vm5 = vcmask 126016   ;;  %vm800_vm6 = vcmask 191616   ;;  %vm919_vm7 = vcmask 257216  }
   0xe   : > { %1059 = vmatpush3.bf16.msra.mxu1 %v1135_v2  ;;  %1052 = vmatprep.subr.bf16.mxu0 %v1162_v1  ;;  %v306_v5 = vld [vmem:[%s293_s14] sm:$0xf]  ;;  %s1168_s25 = smov 80   ;;  %s1327_s13 = scalar_lea.vmem %s1343_s7, %s1245_s11 }
   0xf   : > { %1060 = vmatprep.subr.bf16.mxu1 %v1162_v1  ;;  %1062 = vmatprep.mubr.msk.bf16.mxu1 %vm1163_vm0, %v1162_v1  ;;  %v374_v6 = vld [vmem:[%s297_s17] sm:$0xf]  ;;  %s1171_s14 = smov 8   ;;  %s1172_s11 = smov 16  }
  0x10   : > { %v1007_v8 = vld [vmem:[%s1342_s6] ss:$0 sm:$0xff] }
  0x11   : > { %1053 = vmatpush3.bf16.msra.mxu0 %v1136_v3  ;;  %v1011_v34 = vld [vmem:[%s300_s30] ss:$0 sm:$0xff] }
  0x12   : > { %1061 = vmatpush3.bf16.msra.mxu1 %v1137_v4  ;;  %1066 = vmatprep.subr.bf16.mxu0 %v1162_v1 }
  0x13   : > { %1072 = vmatprep.subr.bf16.mxu1 %v1162_v1 }
  0x14   : > { %1055 = vmatmul.mubr.msk.bf16.vlgmr.msra.gmra.mxu0 %vm330_vm1, %v306_v5 }
  0x15   : > { %1063 = vmatmul.mubr.msk.bf16.vlgmr.msra.gmra.mxu1 %vm330_vm1, %v374_v6  ;;  %1068 = vmatprep.mubr.msk.bf16.mxu0 %vm1163_vm0, %v1162_v1 }
  0x16   : > { %1074 = vmatprep.mubr.msk.bf16.mxu1 %vm1163_vm0, %v1162_v1 }
  0xd4   : > { %v368_v9 = vpop.f32.mrf.mxu0 }
  0xd5   : > { %v369_v10 = vadd.f32 %v1003_v7, %v368_v9  ;;  %v435_v11 = vpop.f32.mrf.mxu1 }
  0xd6   : > { %v436_v12 = vadd.f32 %v1007_v8, %v435_v11  ;;  %v1056_v13 = vpop.f32.mrf.mxu0 }
  0xd7   : > { %v442_v14 = vmul.f32 0.35355338, %v369_v10  ;;  %v1064_v15 = vpop.f32.mrf.mxu1 }
  0xd8   : > { %v1267_v16 = vpack.c.bf16 %v436_v12, %v436_v12  ;;  %v371_v17 = vpop.f32.mrf.mxu0 }
  0xd9   : > { %v438_v18 = vpop.f32.mrf.mxu1  ;;  %v443_v19 = vpack.c.bf16 %v442_v14, %v442_v14 }
  0xda   : > { %685 = vrot.lane.b32.xlu1 %v1267_v16, %s1164_s22  ;;  %566 = vrot.lane.b32.xlu0 %v1267_v16, %s1165_s23  ;;  %v1057_v20 = vpop.f32.mrf.mxu0  ;;  %v456_v21 = vsel %vm451_vm2, %v1267_v16, 0 }
  0xdb   : > { %v1065_v22 = vpop.f32.mrf.mxu1  ;;  %1067 = vmatpush3.bf16.xpose.msra.mxu0 %v456_v21 }
  0xdc   : > { %1078 = vmatprep.subr.bf16.mxu0 %v1162_v1 }
  0xde   : > { %683 = vrot.lane.b32.xlu1 %v443_v19, %s1164_s22  ;;  %564 = vrot.lane.b32.xlu0 %v443_v19, %s1165_s23 }
  0xe2   : > { %802 = vrot.lane.b32.xlu1 %v443_v19, %s1166_s26  ;;  %804 = vrot.lane.b32.xlu0 %v1267_v16, %s1166_s26 }
  0xe3   : > { %1069 = vmatmul.mubr.msk.bf16.vlgmr.msra.gmra.mxu0 %vm451_vm2, %v443_v19 }
  0xe4   : > { %1080 = vmatprep.mubr.msk.bf16.mxu0 %vm1163_vm0, %v1162_v1 }
  0xe6   : > { %509 = vrot.lane.b32.xlu1 %v1267_v16, %s1167_s27 }
 0x14c   : > { %v686_v23 = vpop.permute.xlu1 %685  ;;  %v567_v24 = vpop.permute.xlu0 %566 }
 0x14d   : > { %v572_v25 = vsel %vm451_vm2, %v567_v24, 0  ;;  %v691_v29 = vsel %vm451_vm2, %v686_v23, 0 }
 0x14e   : > { %1079 = vmatpush3.bf16.xpose.msra.mxu0 %v572_v25 }
 0x14f   : > { %1090 = vmatprep.subr.bf16.mxu0 %v1162_v1 }
 0x150   : > { %v684_v26 = vpop.permute.xlu1 %683  ;;  %v565_v27 = vpop.permute.xlu0 %564 }
 0x154   : > { %v803_v28 = vpop.permute.xlu1 %802  ;;  %v805_v32 = vpop.permute.xlu0 %804 }
 0x155   : > { %1081 = vmatmul.mubr.msk.bf16.vlgmr.msra.gmra.mxu0 %vm451_vm2, %v565_v27  ;;  %v810_v33 = vsel %vm451_vm2, %v805_v32, 0 }
 0x156   : > { %1091 = vmatpush3.bf16.xpose.msra.mxu0 %v691_v29  ;;  %1092 = vmatprep.mubr.msk.bf16.mxu0 %vm1163_vm0, %v1162_v1 }
 0x157   : > { %1102 = vmatprep.subr.bf16.mxu0 %v1162_v1 }
 0x158   : > { %v510_v30 = vpop.permute.xlu1 %509 }
 0x159   : > { %v516_v31 = vsel %vm514_vm3, %v510_v30, 0 }
 0x15a   : > { %1073 = vmatpush3.bf16.msra.mxu1 %v516_v31 }
 0x15b   : > { %1084 = vmatprep.subr.bf16.mxu1 %v1162_v1 }
 0x15d   : > { %1093 = vmatmul.mubr.msk.bf16.vlgmr.msra.gmra.mxu0 %vm451_vm2, %v684_v26 }
 0x15e   : > { %1103 = vmatpush3.bf16.xpose.msra.mxu0 %v810_v33  ;;  %1104 = vmatprep.mubr.msk.bf16.mxu0 %vm1163_vm0, %v1162_v1 }
 0x165   : > { %1105 = vmatmul.mubr.msk.bf16.vlgmr.msra.gmra.mxu0 %vm451_vm2, %v803_v28 }
 0x1a3   : > { %v492_v35 = vpop.f32.mrf.mxu0 }
 0x1a4   : > { %v493_v36 = vadd.f32 %v1011_v34, %v492_v35 }
 0x1a5   : > { %v1070_v37 = vpop.f32.mrf.mxu0 }
 0x1a6   : > { %v498_v38 = vsel %vm451_vm2, %v493_v36, -inf }
 0x1a7   : > { %499 = vmax.xlane.f32.xlu0 %v498_v38  ;;  %v495_v39 = vpop.f32.mrf.mxu0 }
 0x1a9   : > { %v1071_v40 = vpop.f32.mrf.mxu0 }
 0x215   : > { %v608_v41 = vpop.f32.mrf.mxu0 }
 0x216   : > { %v609_v42 = vadd.f32 %v1011_v34, %v608_v41 }
 0x217   : > { %v1082_v43 = vpop.f32.mrf.mxu0 }
 0x218   : > { %v614_v44 = vsel %vm451_vm2, %v609_v42, -inf }
 0x219   : > { %615 = vmax.xlane.f32.xlu1 %v614_v44  ;;  %v611_v45 = vpop.f32.mrf.mxu0 }
 0x21b   : > { %v1083_v46 = vpop.f32.mrf.mxu0 }
 0x21d   : > { %v727_v47 = vpop.f32.mrf.mxu0 }
 0x21e   : > { %v728_v48 = vadd.f32 %v1011_v34, %v727_v47 }
 0x21f   : > { %v1094_v49 = vpop.f32.mrf.mxu0 }
 0x220   : > { %v733_v50 = vsel %vm451_vm2, %v728_v48, -inf }
 0x221   : > { %734 = vmax.xlane.f32.xlu0 %v733_v50  ;;  %v730_v51 = vpop.f32.mrf.mxu0 }
 0x223   : > { %v1095_v52 = vpop.f32.mrf.mxu0 }
 0x225   : > { %v846_v53 = vpop.f32.mrf.mxu0 }
 0x226   : > { %v847_v54 = vadd.f32 %v1011_v34, %v846_v53 }
 0x227   : > { %v1106_v55 = vpop.f32.mrf.mxu0 }
 0x228   : > { %v852_v56 = vsel %vm451_vm2, %v847_v54, -inf }
 0x229   : > { %853 = vmax.xlane.f32.xlu0 %v852_v56  ;;  %v849_v57 = vpop.f32.mrf.mxu0 }
 0x22a   : > { %743 = vrot.lane.b32.xlu1 %v1267_v16, %s1168_s25 }
 0x22b   : > { %v1107_v58 = vpop.f32.mrf.mxu0 }
 0x22e   : > { %862 = vrot.lane.b32.xlu1 %v1267_v16, %s1169_s8 }
 0x230   : > { %v500_v59 = vpop.xlane.xlu0 %499 }
 0x231   : > { %v501_v60 = vsub.f32 %v493_v36, %v500_v59 }
 0x233   : > { %v502_v61 = vmul.f32 1.442695, %v501_v60 }
 0x235   : > { %1138 = vpow2.f32 %v502_v61 }
 0x23f   : > { %624 = vrot.lane.b32.xlu0 %v1267_v16, %s1170_s9 }
 0x242   : > { %v1139_v62 = vpop.eup %1138 }
 0x243   : > { %v507_v63 = vpack.c.bf16 %v1139_v62, %v1139_v62  ;;  %v504_v24 = vsel %vm451_vm2, %v1139_v62, 0.0 }
 0x245   : > { %1075 = vmatmul.mubr.msk.bf16.vlgmr.msra.gmra.mxu1 %vm451_vm2, %v507_v63 }
 0x246   : > { %1086 = vmatprep.mubr.msk.bf16.mxu1 %vm1163_vm0, %v1162_v1 }
 0x2a2   : > { %v616_v0 = vpop.xlane.xlu1 %615 }
 0x2a3   : > { %v617_v2 = vsub.f32 %v609_v42, %v616_v0 }
 0x2a5   : > { %v618_v3 = vmul.f32 1.442695, %v617_v2 }
 0x2a6   : > { %v744_v14 = vpop.permute.xlu1 %743 }
 0x2a7   : > { %1140 = vpow2.f32 %v618_v3  ;;  %v749_v16 = vsel %vm514_vm3, %v744_v14, 0 }
 0x2aa   : > { %v735_v4 = vpop.xlane.xlu0 %734  ;;  %v863_v19 = vpop.permute.xlu1 %862 }
 0x2ab   : > { %v736_v5 = vsub.f32 %v728_v48, %v735_v4  ;;  %v868_v21 = vsel %vm514_vm3, %v863_v19, 0 }
 0x2ad   : > { %v737_v6 = vmul.f32 1.442695, %v736_v5 }
 0x2af   : > { %1142 = vpow2.f32 %v737_v6 }
 0x2b2   : > { %v854_v7 = vpop.xlane.xlu0 %853 }
 0x2b3   : > { %v855_v8 = vsub.f32 %v847_v54, %v854_v7 }
 0x2b4   : > { %v1141_v9 = vpop.eup %1140 }
 0x2b5   : > { %v856_v10 = vmul.f32 1.442695, %v855_v8  ;;  %v620_v11 = vsel %vm451_vm2, %v1141_v9, 0.0  ;;  %v623_v15 = vpack.c.bf16 %v1141_v9, %v1141_v9 }
 0x2b6   : > { %621 = vadd.xlane.f32.xlu0 %v620_v11  ;;  %v625_v12 = vpop.permute.xlu0 %624 }
 0x2b7   : > { %1144 = vpow2.f32 %v856_v10  ;;  %v630_v13 = vsel %vm514_vm3, %v625_v12, 0 }
 0x2b8   : > { %1085 = vmatpush3.bf16.msra.mxu1 %v630_v13 }
 0x2b9   : > { %1096 = vmatprep.subr.bf16.mxu1 %v1162_v1 }
 0x2bb   : > { %1087 = vmatmul.mubr.msk.bf16.vlgmr.msra.gmra.mxu1 %vm451_vm2, %v623_v15 }
 0x2bc   : > { %v1143_v17 = vpop.eup %1142  ;;  %1097 = vmatpush3.bf16.msra.mxu1 %v749_v16  ;;  %1098 = vmatprep.mubr.msk.bf16.mxu1 %vm1163_vm0, %v1162_v1 }
 0x2bd   : > { %v739_v18 = vsel %vm451_vm2, %v1143_v17, 0.0  ;;  %1108 = vmatprep.subr.bf16.mxu1 %v1162_v1  ;;  %v742_v20 = vpack.c.bf16 %v1143_v17, %v1143_v17 }
 0x2be   : > { %740 = vadd.xlane.f32.xlu1 %v739_v18 }
 0x2c3   : > { %1099 = vmatmul.mubr.msk.bf16.vlgmr.msra.gmra.mxu1 %vm451_vm2, %v742_v20 }
 0x2c4   : > { %v1145_v22 = vpop.eup %1144  ;;  %1109 = vmatpush3.bf16.msra.mxu1 %v868_v21  ;;  %1110 = vmatprep.mubr.msk.bf16.mxu1 %vm1163_vm0, %v1162_v1 }
 0x2c5   : > { %v858_v23 = vsel %vm451_vm2, %v1145_v22, 0.0  ;;  %v861_v25 = vpack.c.bf16 %v1145_v22, %v1145_v22 }
 0x2c6   : > { %859 = vadd.xlane.f32.xlu0 %v858_v23 }
 0x2ca   : > { %505 = vadd.xlane.f32.xlu0 %v504_v24 }
 0x2cb   : > { %1111 = vmatmul.mubr.msk.bf16.vlgmr.msra.gmra.mxu1 %vm451_vm2, %v861_v25 }
 0x305   : > { %v552_v26 = vpop.f32.mrf.mxu1 }
 0x307   : > { %v1076_v27 = vpop.f32.mrf.mxu1 }
 0x309   : > { %v555_v28 = vpop.f32.mrf.mxu1 }
 0x30b   : > { %v1077_v29 = vpop.f32.mrf.mxu1 }
 0x33f   : > { %v622_v30 = vpop.xlane.xlu0 %621 }
 0x347   : > { %v741_v35 = vpop.xlane.xlu1 %740 }
 0x34f   : > { %v860_v31 = vpop.xlane.xlu0 %859 }
 0x353   : > { %v506_v32 = vpop.xlane.xlu0 %505 }
 0x354   : > { %1146 = vrcp.f32 %v506_v32 }
 0x355   : > { %1148 = vrcp.f32 %v622_v30 }
 0x356   : > { %1150 = vrcp.f32 %v741_v35 }
 0x357   : > { %1152 = vrcp.f32 %v860_v31 }
 0x361   : > { %v1147_v33 = vpop.eup %1146 }
 0x362   : > { %v559_v1 = vmul.f32 %v1147_v33, %v552_v26  ;;  %v1149_v36 = vpop.eup %1148 }
 0x363   : > { %v1151_v43 = vpop.eup %1150 }
 0x364   : > { %v560_v34 = vpack.c.bf16 %v559_v1, %v559_v1  ;;  %v1153_v50 = vpop.eup %1152 }
 0x366   : > { %562 = vst.msk [vmem:[%s1327_s13] sm:$0xf] %vm561_vm4, %v560_v34 }
 0x37b   : > { %v666_v37 = vpop.f32.mrf.mxu1 }
 0x37c   : > { %v673_v38 = vmul.f32 %v1149_v36, %v666_v37 }
 0x37d   : > { %v1088_v39 = vpop.f32.mrf.mxu1 }
 0x37e   : > { %v1025_v40 = vpack.c.bf16 %v673_v38, %v673_v38 }
 0x37f   : > { %v669_v41 = vpop.f32.mrf.mxu1 }
 0x380   : > { %678 = vrot.lane.b32.xlu1 %v1025_v40, %s1171_s14 }
 0x381   : > { %v1089_v42 = vpop.f32.mrf.mxu1 }
 0x383   : > { %v785_v44 = vpop.f32.mrf.mxu1 }
 0x384   : > { %v792_v45 = vmul.f32 %v1151_v43, %v785_v44 }
 0x385   : > { %v1100_v46 = vpop.f32.mrf.mxu1 }
 0x386   : > { %v1026_v47 = vpack.c.bf16 %v792_v45, %v792_v45 }
 0x387   : > { %v788_v48 = vpop.f32.mrf.mxu1 }
 0x388   : > { %797 = vrot.lane.b32.xlu0 %v1026_v47, %s1172_s11 }
 0x389   : > { %v1101_v49 = vpop.f32.mrf.mxu1 }
 0x38b   : > { %v904_v51 = vpop.f32.mrf.mxu1 }
 0x38c   : > { %v911_v52 = vmul.f32 %v1153_v50, %v904_v51 }
 0x38d   : > { %v1112_v53 = vpop.f32.mrf.mxu1 }
 0x38e   : > { %v1027_v54 = vpack.c.bf16 %v911_v52, %v911_v52 }
 0x38f   : > { %v907_v55 = vpop.f32.mrf.mxu1 }
 0x390   : > { %916 = vrot.lane.b32.xlu1 %v1027_v54, %s1173_s15 }
 0x391   : > { %v1113_v56 = vpop.f32.mrf.mxu1 }
 0x3f2   : > { %v679_v57 = vpop.permute.xlu1 %678 }
 0x3f3   : > { %682 = vst.msk [vmem:[%s1327_s13] sm:$0xf] %vm681_vm5, %v679_v57 }
 0x3fa   : > { %v798_v58 = vpop.permute.xlu0 %797 }
 0x3fb   : > { %801 = vst.msk [vmem:[%s1327_s13] sm:$0xf] %vm800_vm6, %v798_v58 }
 0x402   : > { %v917_v59 = vpop.permute.xlu1 %916 }
 0x403   : > { %920 = vst.msk [vmem:[%s1327_s13] sm:$0xf] %vm919_vm7, %v917_v59 }
 0x404 PF: > { %s17_s24 = sadd.s32 1, %s1160_s24  }
 0x405   : > { %p14_p4 = scmp.ge.s32.totalorder %s17_s24, 4  }
 0x407   :  { %16 = sbr.rel (!%p14_p4) target bundleno = 1 (0x1), region = 84 }

</bundles_post_ra>
